<compile_context>
chip_gen: v7x
topology: tpu7x:2x2x1
jax: 0.10.0
libtpu: 0.0.40
codegen_flags: <defaults>
</compile_context>

<pallas_src>
import functools
import numpy as np

import jax
import jax.numpy as jnp
from jax.experimental import pallas as pl
from jax.experimental.pallas import tpu as pltpu

ONE_THIRD = 1.0 / 3.0


def drode_kernel(ag_ref, bg_ref, cg_ref, dg_ref, frac_ref,   # (spc, 4*B, H)/(spc, 4*B, 1)
                 selw_ref, selw0_ref,                          # (spc, B, 1), (B, 1)
                 a0_ref, wi_ref, bi_ref,                       # initial_network Linear
                 wfz_ref,                                      # vector-field z-weight
                 wl_ref, bl_ref,                               # output Linear
                 dt_ref,                                       # SMEM (n_steps_pad,) step sizes
                 pred_ref,                                     # out (B, C_out)
                 z_ref, zsel_ref, xw_ref,                      # scratch (persist across chunks)
                 *, spc, batch):
    f32 = jnp.float32
    B = batch
    c = pl.program_id(0)

    # ---- Hoisted X path (per chunk): Horner directly in hidden space -------------
    # wfx and bf were folded into (ag, bg, cg, dg) in the wrapper, so this is pure
    # VPU work producing xw[step, stage*B:(stage+1)*B, :] with no in-kernel matmul.
    frac = frac_ref[...]                                       # (spc, 4B, 1) broadcasts over H
    xw_ref[...] = ((dg_ref[...] * frac + cg_ref[...]) * frac + bg_ref[...]) * frac + ag_ref[...]

    # ---- chunk-0 init: z0 = initial_network(X(times[0])) -------------------------
    @pl.when(c == 0)
    def _():
        z0 = jnp.dot(a0_ref[...], wi_ref[...], preferred_element_type=f32) + bi_ref[...]
        z_ref[...] = z0
        zsel_ref[...] = selw0_ref[...] * z0

    # Hoist the recurrent weight load out of the unrolled chain (one load per chunk).
    wfz = wfz_ref[...]

    z = z_ref[...]
    zsel = zsel_ref[...]

    def vf(zz, s, q):
        return jnp.tanh(jnp.dot(zz, wfz, preferred_element_type=f32)
                        + xw_ref[s, q * B:(q + 1) * B, :])

    # Statically unrolled within the chunk; the chunk grid axis bounds live ranges.
    for s in range(spc):
        dt = dt_ref[c * spc + s]
        k1 = vf(z, s, 0)                                       # torchdiffeq 3/8-rule RK4
        k2 = vf(z + dt * k1 * ONE_THIRD, s, 1)
        k3 = vf(z + dt * (k2 - k1 * ONE_THIRD), s, 2)
        k4 = vf(z + dt * (k1 - k2 + k3), s, 3)
        z = z + dt * 0.125 * (k1 + 3.0 * (k2 + k3) + k4)
        zsel = zsel + selw_ref[s] * z                          # fold interp + final_index gather

    z_ref[...] = z
    zsel_ref[...] = zsel

    # ---- last chunk: final Linear hidden_channels -> output_channels -------------
    @pl.when(c == pl.num_programs(0) - 1)
    def _():
        pred_ref[...] = jnp.dot(zsel, wl_ref[...], preferred_element_type=f32) + bl_ref[...]


def _pick_chunk(n_steps, target):
    """Chunk the RK4 steps: minimize dt=0 padding, prefer larger chunks (<= target)."""
    if n_steps <= target:
        return n_steps, 1
    best = None
    for spc in range(2, target + 1):
        pad = (-n_steps) % spc
        key = (pad, -spc)
        if best is None or key < best[0]:
            best = (key, spc)
    spc = best[1]
    return spc, -(-n_steps // spc)


def direct_recurrent_ode_forward(coeffs_tm, params, sched, *, target_chunk=8):
    """coeffs_tm: (a,b,c,d) time-major (T-1, B, C_in); params: the three Linears (split)."""
    a, b, c, d = coeffs_tm
    wfz, wfx, bf, wi, bi, wl, bl = params
    Tm1, B, C_in = a.shape
    H = wi.shape[1]
    C_out = wl.shape[1]
    n_steps = sched["n_steps"]

    # Guard: in-kernel per-stage row slices and the (B, H) carries assume sublane
    # alignment; pad the batch to a multiple of 8 upstream for other sizes.
    assert B % 8 == 0, "batch must be a multiple of 8 (pad upstream)"

    spc, n_chunks = _pick_chunk(n_steps, target_chunk)
    n_pad = n_chunks * spc

    # Pre-gather per-stage spline coefficients at host-known interval indices and fold
    # the vector-field X-projection (wfx, bf) into them (one XLA einsum per coefficient)
    # so the kernel works directly in hidden space (lane-denser, no in-kernel X matmul).
    sidx = np.asarray(sched["stage_idx"]).reshape(-1)            # (n_steps*4,) host ints

    def proj(coef, bias=None):
        g = jnp.einsum("sbc,ch->sbh", coef[sidx], wfx,
                       preferred_element_type=jnp.float32)       # (n_steps*4, B, H)
        if bias is not None:
            g = g + bias
        g = g.reshape(n_steps, 4 * B, H)
        return jnp.pad(g, ((0, n_pad - n_steps), (0, 0), (0, 0)))

    ag = proj(a, bf)
    bg = proj(b)
    cg = proj(c)
    dg = proj(d)

    # Fractional offsets per stage as a thin (n_pad, 4*B, 1) column (broadcast in-kernel).
    frac_np = np.zeros((n_pad, 4, 1, 1), np.float32)
    frac_np[:n_steps] = sched["stage_frac"].reshape(n_steps, 4, 1, 1)
    frac = jnp.asarray(np.broadcast_to(frac_np, (n_pad, 4, B, 1)).reshape(n_pad, 4 * B, 1))

    # Per-step selection weights (fold output-time interpolation + per-batch gather).
    selw_np = np.zeros((n_pad, B, 1), np.float32)
    selw_np[:n_steps] = sched["sel_w"][1:]
    selw = jnp.asarray(selw_np)
    selw0 = jnp.asarray(sched["sel_w"][0], jnp.float32)          # (B, 1)

    dt_np = np.zeros((n_pad,), np.float32)                       # padded steps: dt = 0 (no-op)
    dt_np[:n_steps] = sched["dt"]
    dt_arr = jnp.asarray(dt_np)

    a0 = a[0]                                                    # X(times[0]) = a[0] (frac = 0)

    step3 = lambda shape: pl.BlockSpec(shape, lambda ci: (ci, 0, 0))
    const2 = lambda shape: pl.BlockSpec(shape, lambda ci: (0, 0))

    kernel = functools.partial(drode_kernel, spc=spc, batch=B)

    return pl.pallas_call(
        kernel,
        out_shape=jax.ShapeDtypeStruct((B, C_out), jnp.float32),
        grid=(n_chunks,),
        in_specs=[
            step3((spc, 4 * B, H)),     # ag  (a @ wfx + bf), streamed per chunk
            step3((spc, 4 * B, H)),     # bg  (b @ wfx)
            step3((spc, 4 * B, H)),     # cg  (c @ wfx)
            step3((spc, 4 * B, H)),     # dg  (d @ wfx)
            step3((spc, 4 * B, 1)),     # frac
            step3((spc, B, 1)),         # selection weights for steps 1..n_steps
            const2((B, 1)),             # selection weight for z0
            const2((B, C_in)),          # a0 = X(times[0])
            const2((C_in, H)),          # wi (initial_network)
            const2((1, H)),             # bi
            const2((H, H)),             # wfz (vector field, z part)
            const2((H, C_out)),         # wl (output linear)
            const2((1, C_out)),         # bl
            pl.BlockSpec(memory_space=pltpu.MemorySpace.SMEM),   # dt schedule (scalar table)
        ],
        out_specs=const2((B, C_out)),
        scratch_shapes=[
            pltpu.VMEM((B, H), jnp.float32),           # z carry (persists across chunks)
            pltpu.VMEM((B, H), jnp.float32),           # z_sel accumulator
            pltpu.VMEM((spc, 4 * B, H), jnp.float32),  # per-chunk xw
        ],
        compiler_params=pltpu.CompilerParams(
            dimension_semantics=("arbitrary",)),
    )(ag, bg, cg, dg, frac, selw, selw0, a0, wi, bi, wfz, wl, bl, dt_arr)


def build_host_schedule(times, final_index):
    """Mirrors the PyTorch stream=False branch + torchdiffeq fixed-grid rk4 setup."""
    times = np.asarray(times, np.float64)
    T = len(times)
    B = final_index.shape[0]
    assert final_index.shape == (B,), "coeff.shape[:-2] must equal final_index.shape"
    assert np.all(np.diff(times) > 0)

    # --- output-time construction (torch.unique logic) ---
    sorted_fi, inverse_fi = np.unique(final_index, return_inverse=True)
    if 0 in sorted_fi:
        sorted_fi = sorted_fi[1:]
        gather_index = inverse_fi
    else:
        gather_index = inverse_fi + 1
    if (T - 1) in sorted_fi:
        sorted_fi = sorted_fi[:-1]
    t_out = np.concatenate([times[:1], times[sorted_fi], times[-1:]])
    n_out = len(t_out)
    gather_index = np.asarray(gather_index, np.int64)
    assert gather_index.min() >= 0 and gather_index.max() < n_out

    # --- rk4 step size = min(diff(times)) ---
    step_size = float(np.min(times[1:] - times[:-1]))

    # --- torchdiffeq _grid_constructor_from_step_size ---
    start, end = float(t_out[0]), float(t_out[-1])
    niters = int(np.ceil((end - start) / step_size + 1.0))
    grid = np.arange(niters, dtype=np.float64) * step_size + start
    grid[-1] = end
    n_steps = len(grid) - 1

    # --- per-step RK4 stage schedule (spline interval index + fractional part) ---
    stage_idx = np.zeros((n_steps, 4), np.int32)
    stage_frac = np.zeros((n_steps, 4), np.float32)
    dt_arr = np.zeros((n_steps,), np.float32)
    for s in range(n_steps):
        t0, t1 = grid[s], grid[s + 1]
        dt = t1 - t0
        dt_arr[s] = dt
        taus = [t0, t0 + dt * ONE_THIRD, t0 + 2.0 * dt * ONE_THIRD, t1]
        for q, tau in enumerate(taus):
            idx = int(np.clip(np.searchsorted(times, tau, side="left") - 1, 0, T - 2))
            stage_idx[s, q] = idx
            stage_frac[s, q] = tau - times[idx]

    # --- output linear-interpolation schedule (FixedGridODESolver.integrate) ---
    out_j0 = np.zeros((n_out,), np.int32)
    out_j1 = np.zeros((n_out,), np.int32)
    out_w = np.zeros((n_out,), np.float32)
    out_j0[0] = out_j1[0] = 0
    out_w[0] = 0.0
    j = 1
    for s in range(n_steps):
        t0, t1 = grid[s], grid[s + 1]
        while j < n_out and t1 >= t_out[j]:
            tk = t_out[j]
            if tk == t0:
                out_j0[j] = s; out_j1[j] = s; out_w[j] = 0.0
            elif tk == t1:
                out_j0[j] = s + 1; out_j1[j] = s + 1; out_w[j] = 0.0
            else:
                out_j0[j] = s; out_j1[j] = s + 1
                out_w[j] = (tk - t0) / (t1 - t0)
            j += 1

    # --- per-step selection weights: fold interpolation + per-batch gather ---------
    # z_sel[b] = sum_s sel_w[s, b] * traj[s]  with at most two nonzeros per column.
    sel_w = np.zeros((n_steps + 1, B, 1), np.float32)
    for bidx in range(B):
        g = int(gather_index[bidx])
        j0, j1, w = int(out_j0[g]), int(out_j1[g]), float(out_w[g])
        sel_w[j0, bidx, 0] += 1.0 - w
        sel_w[j1, bidx, 0] += w

    return dict(stage_idx=stage_idx, stage_frac=stage_frac, dt=dt_arr,
                out_j0=out_j0, out_j1=out_j1, out_w=out_w,
                gather_index=gather_index, sel_w=sel_w,
                n_steps=n_steps, n_out=n_out)


def reference_forward(coeffs_tm, params, sched):
    """Independent float64 numpy reference using the raw (un-folded) schedule."""
    a, b, c, d = [np.asarray(x, np.float64) for x in coeffs_tm]
    wfz, wfx, bf, wi, bi, wl, bl = [np.asarray(p, np.float64) for p in params]
    stage_idx, stage_frac = sched["stage_idx"], sched["stage_frac"]
    dt_arr, out_j0, out_j1, out_w = sched["dt"], sched["out_j0"], sched["out_j1"], sched["out_w"]
    gather_index, n_steps, n_out = sched["gather_index"], sched["n_steps"], sched["n_out"]
    B = a.shape[1]

    def spline(idx, frac):
        return ((d[idx] * frac + c[idx]) * frac + b[idx]) * frac + a[idx]

    def vf(z, x):
        return np.tanh(z @ wfz + x @ wfx + bf)

    z = a[0] @ wi + bi
    traj = [z]
    for s in range(n_steps):
        dt = float(dt_arr[s])
        k1 = vf(z, spline(int(stage_idx[s, 0]), float(stage_frac[s, 0])))
        k2 = vf(z + dt * k1 * ONE_THIRD, spline(int(stage_idx[s, 1]), float(stage_frac[s, 1])))
        k3 = vf(z + dt * (k2 - k1 * ONE_THIRD), spline(int(stage_idx[s, 2]), float(stage_frac[s, 2])))
        k4 = vf(z + dt * (k1 - k2 + k3), spline(int(stage_idx[s, 3]), float(stage_frac[s, 3])))
        z = z + dt * 0.125 * (k1 + 3.0 * (k2 + k3) + k4)
        traj.append(z)
    traj = np.stack(traj)                                   # (n_steps+1, B, H)

    z_t = np.stack([(1.0 - float(out_w[k])) * traj[int(out_j0[k])]
                    + float(out_w[k]) * traj[int(out_j1[k])] for k in range(n_out)])
    z_sel = z_t[gather_index, np.arange(B)]                 # (B, H)
    return z_sel @ wl + bl


if __name__ == "__main__":
    B, T, C_in, H, C_out = 8, 8, 6, 32, 4

    times = np.array([0.0, 0.9, 2.1, 3.0, 4.2, 5.0, 6.3, 7.0], dtype=np.float32)
    final_index = np.array([7, 7, 5, 7, 3, 7, 7, 6], dtype=np.int64)   # shape (B,)

    sched = build_host_schedule(times, final_index)

    # deterministic synthetic spline coefficients + parameters
    key = jax.random.PRNGKey(0)
    ks = jax.random.split(key, 11)
    coeff_a = 0.5 * jax.random.normal(ks[0], (B, T - 1, C_in), jnp.float32)
    coeff_b = 0.5 * jax.random.normal(ks[1], (B, T - 1, C_in), jnp.float32)
    coeff_c = 0.5 * jax.random.normal(ks[2], (B, T - 1, C_in), jnp.float32)
    coeff_d = 0.5 * jax.random.normal(ks[3], (B, T - 1, C_in), jnp.float32)
    # kernel layout: time-major (T-1, B, C_in)
    coeffs_tm = tuple(jnp.transpose(x, (1, 0, 2)) for x in (coeff_a, coeff_b, coeff_c, coeff_d))

    wi = jax.random.normal(ks[4], (C_in, H), jnp.float32) / np.sqrt(C_in)
    bi = 0.1 * jax.random.normal(ks[5], (1, H), jnp.float32)
    wfz = jax.random.normal(ks[6], (H, H), jnp.float32) / np.sqrt(H + C_in)
    wfx = jax.random.normal(ks[7], (C_in, H), jnp.float32) / np.sqrt(H + C_in)
    bf = 0.1 * jax.random.normal(ks[8], (1, H), jnp.float32)
    wl = jax.random.normal(ks[9], (H, C_out), jnp.float32) / np.sqrt(H)
    bl = 0.1 * jax.random.normal(ks[10], (1, C_out), jnp.float32)
    params = (wfz, wfx, bf, wi, bi, wl, bl)

    pred = direct_recurrent_ode_forward(coeffs_tm, params, sched)
    pred = jax.block_until_ready(pred)

    ref = reference_forward(coeffs_tm, params, sched)

    assert pred.shape == (B, C_out)
    assert np.all(np.isfinite(np.asarray(pred)))
    assert np.allclose(np.asarray(pred), ref, rtol=2e-2, atol=2e-2), \
        f"kernel/reference mismatch:\n{np.asarray(pred)}\n{ref}"

    print("KERNEL_OK")
</pallas_src>

<mosaic_0001>
module attributes {stable_mosaic.version = 11 : i64} {
  func.func @drode_kernel(%arg0: i32, %arg1: memref<6x32x32xf32, #tpu.memory_space<vmem>>, %arg2: memref<6x32x32xf32, #tpu.memory_space<vmem>>, %arg3: memref<6x32x32xf32, #tpu.memory_space<vmem>>, %arg4: memref<6x32x32xf32, #tpu.memory_space<vmem>>, %arg5: memref<6x32x1xf32, #tpu.memory_space<vmem>>, %arg6: memref<6x8x1xf32, #tpu.memory_space<vmem>>, %arg7: memref<8x1xf32, #tpu.memory_space<vmem>>, %arg8: memref<8x6xf32, #tpu.memory_space<vmem>>, %arg9: memref<6x32xf32, #tpu.memory_space<vmem>>, %arg10: memref<1x32xf32, #tpu.memory_space<vmem>>, %arg11: memref<32x32xf32, #tpu.memory_space<vmem>>, %arg12: memref<32x4xf32, #tpu.memory_space<vmem>>, %arg13: memref<1x4xf32, #tpu.memory_space<vmem>>, %arg14: memref<12xf32, #tpu.memory_space<smem>>, %arg15: memref<8x4xf32, #tpu.memory_space<vmem>>, %arg16: memref<8x32xf32, #tpu.memory_space<vmem>>, %arg17: memref<8x32xf32, #tpu.memory_space<vmem>>, %arg18: memref<6x32x32xf32, #tpu.memory_space<vmem>>) attributes {dimension_semantics = [#tpu.dimension_semantics<arbitrary>], iteration_bounds = array<i64: 2>, scalar_prefetch = 0 : i64, scratch_operands = 3 : i64, tpu.core_type = #tpu.core_type<tc>, window_params = [{transform_indices = @transform_0, window_bounds = array<i64: 6, 32, 32>}, {transform_indices = @transform_1, window_bounds = array<i64: 6, 32, 32>}, {transform_indices = @transform_2, window_bounds = array<i64: 6, 32, 32>}, {transform_indices = @transform_3, window_bounds = array<i64: 6, 32, 32>}, {transform_indices = @transform_4, window_bounds = array<i64: 6, 32, 1>}, {transform_indices = @transform_5, window_bounds = array<i64: 6, 8, 1>}, {pipeline_mode = #tpu.pipeline_mode<synchronous>, transform_indices = @transform_6, window_bounds = array<i64: 8, 1>}, {pipeline_mode = #tpu.pipeline_mode<synchronous>, transform_indices = @transform_7, window_bounds = array<i64: 8, 6>}, {pipeline_mode = #tpu.pipeline_mode<synchronous>, transform_indices = @transform_8, window_bounds = array<i64: 6, 32>}, {pipeline_mode = #tpu.pipeline_mode<synchronous>, transform_indices = @transform_9, window_bounds = array<i64: 1, 32>}, {pipeline_mode = #tpu.pipeline_mode<synchronous>, transform_indices = @transform_10, window_bounds = array<i64: 32, 32>}, {pipeline_mode = #tpu.pipeline_mode<synchronous>, transform_indices = @transform_11, window_bounds = array<i64: 32, 4>}, {pipeline_mode = #tpu.pipeline_mode<synchronous>, transform_indices = @transform_12, window_bounds = array<i64: 1, 4>}, {transform_indices = @transform_13, window_bounds = array<i64: 12>}, {pipeline_mode = #tpu.pipeline_mode<synchronous>, transform_indices = @transform_14, window_bounds = array<i64: 8, 4>}]} {
    %c0 = arith.constant 0 : index
    %c0_0 = arith.constant 0 : index
    %c0_1 = arith.constant 0 : index
    %0 = vector.load %arg5[%c0, %c0_0, %c0_1] : memref<6x32x1xf32, #tpu.memory_space<vmem>>, vector<6x32x1xf32>
    %c0_2 = arith.constant 0 : index
    %c0_3 = arith.constant 0 : index
    %c0_4 = arith.constant 0 : index
    %1 = vector.load %arg4[%c0_2, %c0_3, %c0_4] : memref<6x32x32xf32, #tpu.memory_space<vmem>>, vector<6x32x32xf32>
    %2 = vector.broadcast %0 : vector<6x32x1xf32> to vector<6x32x32xf32>
    %3 = arith.mulf %1, %2 : vector<6x32x32xf32>
    %c0_5 = arith.constant 0 : index
    %c0_6 = arith.constant 0 : index
    %c0_7 = arith.constant 0 : index
    %4 = vector.load %arg3[%c0_5, %c0_6, %c0_7] : memref<6x32x32xf32, #tpu.memory_space<vmem>>, vector<6x32x32xf32>
    %5 = arith.addf %3, %4 : vector<6x32x32xf32>
    %6 = vector.broadcast %0 : vector<6x32x1xf32> to vector<6x32x32xf32>
    %7 = arith.mulf %5, %6 : vector<6x32x32xf32>
    %c0_8 = arith.constant 0 : index
    %c0_9 = arith.constant 0 : index
    %c0_10 = arith.constant 0 : index
    %8 = vector.load %arg2[%c0_8, %c0_9, %c0_10] : memref<6x32x32xf32, #tpu.memory_space<vmem>>, vector<6x32x32xf32>
    %9 = arith.addf %7, %8 : vector<6x32x32xf32>
    %10 = vector.broadcast %0 : vector<6x32x1xf32> to vector<6x32x32xf32>
    %11 = arith.mulf %9, %10 : vector<6x32x32xf32>
    %c0_11 = arith.constant 0 : index
    %c0_12 = arith.constant 0 : index
    %c0_13 = arith.constant 0 : index
    %12 = vector.load %arg1[%c0_11, %c0_12, %c0_13] : memref<6x32x32xf32, #tpu.memory_space<vmem>>, vector<6x32x32xf32>
    %13 = arith.addf %11, %12 : vector<6x32x32xf32>
    %c0_14 = arith.constant 0 : index
    %c0_15 = arith.constant 0 : index
    %c0_16 = arith.constant 0 : index
    %14 = vector.load %arg18[%c0_14, %c0_15, %c0_16] : memref<6x32x32xf32, #tpu.memory_space<vmem>>, vector<6x32x32xf32>
    tpu.vector_store %arg18[%c0_14, %c0_15, %c0_16], %13 {strides = array<i32>} : memref<6x32x32xf32, #tpu.memory_space<vmem>>, vector<6x32x32xf32>,
    %c0_i32 = arith.constant 0 : i32
    %15 = arith.cmpi eq, %arg0, %c0_i32 : i32
    %16 = arith.extui %15 : i1 to i32
    %c0_i32_17 = arith.constant 0 : i32
    %17 = arith.cmpi ne, %16, %c0_i32_17 : i32
    scf.if %17 {
      %c0_165 = arith.constant 0 : index
      %c0_166 = arith.constant 0 : index
      %350 = vector.load %arg8[%c0_165, %c0_166] : memref<8x6xf32, #tpu.memory_space<vmem>>, vector<8x6xf32>
      %c0_167 = arith.constant 0 : index
      %c0_168 = arith.constant 0 : index
      %351 = vector.load %arg9[%c0_167, %c0_168] : memref<6x32xf32, #tpu.memory_space<vmem>>, vector<6x32xf32>
      %cst_169 = arith.constant dense<0.000000e+00> : vector<8x32xf32>
      %352 = tpu.matmul %350, %351, %cst_169 {dimension_numbers = #tpu.dot_dimension_numbers<[1], [0], [0], [1], [0, 0, 1, 1], [], []>} : vector<8x6xf32>, vector<6x32xf32>, vector<8x32xf32> -> vector<8x32xf32>
      %c0_170 = arith.constant 0 : index
      %c0_171 = arith.constant 0 : index
      %353 = vector.load %arg10[%c0_170, %c0_171] : memref<1x32xf32, #tpu.memory_space<vmem>>, vector<1x32xf32>
      %354 = vector.broadcast %353 : vector<1x32xf32> to vector<8x32xf32>
      %355 = arith.addf %352, %354 : vector<8x32xf32>
      %c0_172 = arith.constant 0 : index
      %c0_173 = arith.constant 0 : index
      %356 = vector.load %arg16[%c0_172, %c0_173] : memref<8x32xf32, #tpu.memory_space<vmem>>, vector<8x32xf32>
      tpu.vector_store %arg16[%c0_172, %c0_173], %355 {strides = array<i32>} : memref<8x32xf32, #tpu.memory_space<vmem>>, vector<8x32xf32>,
      %c0_174 = arith.constant 0 : index
      %c0_175 = arith.constant 0 : index
      %357 = vector.load %arg7[%c0_174, %c0_175] : memref<8x1xf32, #tpu.memory_space<vmem>>, vector<8x1xf32>
      %358 = vector.broadcast %357 : vector<8x1xf32> to vector<8x32xf32>
      %359 = arith.mulf %358, %355 : vector<8x32xf32>
      %c0_176 = arith.constant 0 : index
      %c0_177 = arith.constant 0 : index
      %360 = vector.load %arg17[%c0_176, %c0_177] : memref<8x32xf32, #tpu.memory_space<vmem>>, vector<8x32xf32>
      tpu.vector_store %arg17[%c0_176, %c0_177], %359 {strides = array<i32>} : memref<8x32xf32, #tpu.memory_space<vmem>>, vector<8x32xf32>,
    } else {
    }
    %c0_18 = arith.constant 0 : index
    %c0_19 = arith.constant 0 : index
    %18 = vector.load %arg11[%c0_18, %c0_19] : memref<32x32xf32, #tpu.memory_space<vmem>>, vector<32x32xf32>
    %c0_20 = arith.constant 0 : index
    %c0_21 = arith.constant 0 : index
    %19 = vector.load %arg16[%c0_20, %c0_21] : memref<8x32xf32, #tpu.memory_space<vmem>>, vector<8x32xf32>
    %c0_22 = arith.constant 0 : index
    %c0_23 = arith.constant 0 : index
    %20 = vector.load %arg17[%c0_22, %c0_23] : memref<8x32xf32, #tpu.memory_space<vmem>>, vector<8x32xf32>
    %c6_i32 = arith.constant 6 : i32
    %21 = arith.muli %arg0, %c6_i32 : i32
    %c0_i32_24 = arith.constant 0 : i32
    %22 = arith.addi %21, %c0_i32_24 : i32
    %23 = arith.index_cast %22 : i32 to index
    %24 = memref.load %arg14[%23] : memref<12xf32, #tpu.memory_space<smem>>
    %cst = arith.constant dense<0.000000e+00> : vector<8x32xf32>
    %25 = tpu.matmul %19, %18, %cst {dimension_numbers = #tpu.dot_dimension_numbers<[1], [0], [0], [1], [0, 0, 1, 1], [], []>} : vector<8x32xf32>, vector<32x32xf32>, vector<8x32xf32> -> vector<8x32xf32>
    %c0_25 = arith.constant 0 : index
    %c0_26 = arith.constant 0 : index
    %c0_27 = arith.constant 0 : index
    %26 = vector.load %arg18[%c0_25, %c0_26, %c0_27] : memref<6x32x32xf32, #tpu.memory_space<vmem>>, vector<1x8x32xf32>
    %27 = vector.shape_cast %26 : vector<1x8x32xf32> to vector<8x32xf32>
    %28 = arith.addf %25, %27 : vector<8x32xf32>
    %29 = math.tanh %28 : vector<8x32xf32>
    %30 = vector.broadcast %24 : f32 to vector<8x32xf32>
    %31 = arith.mulf %30, %29 : vector<8x32xf32>
    %cst_28 = arith.constant 0.333333343 : f32
    %32 = vector.broadcast %cst_28 : f32 to vector<8x32xf32>
    %33 = arith.mulf %31, %32 : vector<8x32xf32>
    %34 = arith.addf %19, %33 : vector<8x32xf32>
    %cst_29 = arith.constant dense<0.000000e+00> : vector<8x32xf32>
    %35 = tpu.matmul %34, %18, %cst_29 {dimension_numbers = #tpu.dot_dimension_numbers<[1], [0], [0], [1], [0, 0, 1, 1], [], []>} : vector<8x32xf32>, vector<32x32xf32>, vector<8x32xf32> -> vector<8x32xf32>
    %c0_30 = arith.constant 0 : index
    %c8 = arith.constant 8 : index
    %c0_31 = arith.constant 0 : index
    %36 = vector.load %arg18[%c0_30, %c8, %c0_31] : memref<6x32x32xf32, #tpu.memory_space<vmem>>, vector<1x8x32xf32>
    %37 = vector.shape_cast %36 : vector<1x8x32xf32> to vector<8x32xf32>
    %38 = arith.addf %35, %37 : vector<8x32xf32>
    %39 = math.tanh %38 : vector<8x32xf32>
    %cst_32 = arith.constant 0.333333343 : f32
    %40 = vector.broadcast %cst_32 : f32 to vector<8x32xf32>
    %41 = arith.mulf %29, %40 : vector<8x32xf32>
    %42 = arith.subf %39, %41 : vector<8x32xf32>
    %43 = vector.broadcast %24 : f32 to vector<8x32xf32>
    %44 = arith.mulf %43, %42 : vector<8x32xf32>
    %45 = arith.addf %19, %44 : vector<8x32xf32>
    %cst_33 = arith.constant dense<0.000000e+00> : vector<8x32xf32>
    %46 = tpu.matmul %45, %18, %cst_33 {dimension_numbers = #tpu.dot_dimension_numbers<[1], [0], [0], [1], [0, 0, 1, 1], [], []>} : vector<8x32xf32>, vector<32x32xf32>, vector<8x32xf32> -> vector<8x32xf32>
    %c0_34 = arith.constant 0 : index
    %c16 = arith.constant 16 : index
    %c0_35 = arith.constant 0 : index
    %47 = vector.load %arg18[%c0_34, %c16, %c0_35] : memref<6x32x32xf32, #tpu.memory_space<vmem>>, vector<1x8x32xf32>
    %48 = vector.shape_cast %47 : vector<1x8x32xf32> to vector<8x32xf32>
    %49 = arith.addf %46, %48 : vector<8x32xf32>
    %50 = math.tanh %49 : vector<8x32xf32>
    %51 = arith.subf %29, %39 : vector<8x32xf32>
    %52 = arith.addf %51, %50 : vector<8x32xf32>
    %53 = vector.broadcast %24 : f32 to vector<8x32xf32>
    %54 = arith.mulf %53, %52 : vector<8x32xf32>
    %55 = arith.addf %19, %54 : vector<8x32xf32>
    %cst_36 = arith.constant dense<0.000000e+00> : vector<8x32xf32>
    %56 = tpu.matmul %55, %18, %cst_36 {dimension_numbers = #tpu.dot_dimension_numbers<[1], [0], [0], [1], [0, 0, 1, 1], [], []>} : vector<8x32xf32>, vector<32x32xf32>, vector<8x32xf32> -> vector<8x32xf32>
    %c0_37 = arith.constant 0 : index
    %c24 = arith.constant 24 : index
    %c0_38 = arith.constant 0 : index
    %57 = vector.load %arg18[%c0_37, %c24, %c0_38] : memref<6x32x32xf32, #tpu.memory_space<vmem>>, vector<1x8x32xf32>
    %58 = vector.shape_cast %57 : vector<1x8x32xf32> to vector<8x32xf32>
    %59 = arith.addf %56, %58 : vector<8x32xf32>
    %60 = math.tanh %59 : vector<8x32xf32>
    %cst_39 = arith.constant 1.250000e-01 : f32
    %61 = arith.mulf %24, %cst_39 : f32
    %62 = arith.addf %39, %50 : vector<8x32xf32>
    %cst_40 = arith.constant 3.000000e+00 : f32
    %63 = vector.broadcast %cst_40 : f32 to vector<8x32xf32>
    %64 = arith.mulf %63, %62 : vector<8x32xf32>
    %65 = arith.addf %29, %64 : vector<8x32xf32>
    %66 = arith.addf %65, %60 : vector<8x32xf32>
    %67 = vector.broadcast %61 : f32 to vector<8x32xf32>
    %68 = arith.mulf %67, %66 : vector<8x32xf32>
    %69 = arith.addf %19, %68 : vector<8x32xf32>
    %c0_41 = arith.constant 0 : index
    %c0_42 = arith.constant 0 : index
    %c0_43 = arith.constant 0 : index
    %70 = vector.load %arg6[%c0_41, %c0_42, %c0_43] : memref<6x8x1xf32, #tpu.memory_space<vmem>>, vector<1x8x1xf32>
    %71 = vector.shape_cast %70 : vector<1x8x1xf32> to vector<8x1xf32>
    %72 = vector.broadcast %71 : vector<8x1xf32> to vector<8x32xf32>
    %73 = arith.mulf %72, %69 : vector<8x32xf32>
    %74 = arith.addf %20, %73 : vector<8x32xf32>
    %c6_i32_44 = arith.constant 6 : i32
    %75 = arith.muli %arg0, %c6_i32_44 : i32
    %c1_i32 = arith.constant 1 : i32
    %76 = arith.addi %75, %c1_i32 : i32
    %77 = arith.index_cast %76 : i32 to index
    %78 = memref.load %arg14[%77] : memref<12xf32, #tpu.memory_space<smem>>
    %cst_45 = arith.constant dense<0.000000e+00> : vector<8x32xf32>
    %79 = tpu.matmul %69, %18, %cst_45 {dimension_numbers = #tpu.dot_dimension_numbers<[1], [0], [0], [1], [0, 0, 1, 1], [], []>} : vector<8x32xf32>, vector<32x32xf32>, vector<8x32xf32> -> vector<8x32xf32>
    %c1 = arith.constant 1 : index
    %c0_46 = arith.constant 0 : index
    %c0_47 = arith.constant 0 : index
    %80 = vector.load %arg18[%c1, %c0_46, %c0_47] : memref<6x32x32xf32, #tpu.memory_space<vmem>>, vector<1x8x32xf32>
    %81 = vector.shape_cast %80 : vector<1x8x32xf32> to vector<8x32xf32>
    %82 = arith.addf %79, %81 : vector<8x32xf32>
    %83 = math.tanh %82 : vector<8x32xf32>
    %84 = vector.broadcast %78 : f32 to vector<8x32xf32>
    %85 = arith.mulf %84, %83 : vector<8x32xf32>
    %cst_48 = arith.constant 0.333333343 : f32
    %86 = vector.broadcast %cst_48 : f32 to vector<8x32xf32>
    %87 = arith.mulf %85, %86 : vector<8x32xf32>
    %88 = arith.addf %69, %87 : vector<8x32xf32>
    %cst_49 = arith.constant dense<0.000000e+00> : vector<8x32xf32>
    %89 = tpu.matmul %88, %18, %cst_49 {dimension_numbers = #tpu.dot_dimension_numbers<[1], [0], [0], [1], [0, 0, 1, 1], [], []>} : vector<8x32xf32>, vector<32x32xf32>, vector<8x32xf32> -> vector<8x32xf32>
    %c1_50 = arith.constant 1 : index
    %c8_51 = arith.constant 8 : index
    %c0_52 = arith.constant 0 : index
    %90 = vector.load %arg18[%c1_50, %c8_51, %c0_52] : memref<6x32x32xf32, #tpu.memory_space<vmem>>, vector<1x8x32xf32>
    %91 = vector.shape_cast %90 : vector<1x8x32xf32> to vector<8x32xf32>
    %92 = arith.addf %89, %91 : vector<8x32xf32>
    %93 = math.tanh %92 : vector<8x32xf32>
    %cst_53 = arith.constant 0.333333343 : f32
    %94 = vector.broadcast %cst_53 : f32 to vector<8x32xf32>
    %95 = arith.mulf %83, %94 : vector<8x32xf32>
    %96 = arith.subf %93, %95 : vector<8x32xf32>
    %97 = vector.broadcast %78 : f32 to vector<8x32xf32>
    %98 = arith.mulf %97, %96 : vector<8x32xf32>
    %99 = arith.addf %69, %98 : vector<8x32xf32>
    %cst_54 = arith.constant dense<0.000000e+00> : vector<8x32xf32>
    %100 = tpu.matmul %99, %18, %cst_54 {dimension_numbers = #tpu.dot_dimension_numbers<[1], [0], [0], [1], [0, 0, 1, 1], [], []>} : vector<8x32xf32>, vector<32x32xf32>, vector<8x32xf32> -> vector<8x32xf32>
    %c1_55 = arith.constant 1 : index
    %c16_56 = arith.constant 16 : index
    %c0_57 = arith.constant 0 : index
    %101 = vector.load %arg18[%c1_55, %c16_56, %c0_57] : memref<6x32x32xf32, #tpu.memory_space<vmem>>, vector<1x8x32xf32>
    %102 = vector.shape_cast %101 : vector<1x8x32xf32> to vector<8x32xf32>
    %103 = arith.addf %100, %102 : vector<8x32xf32>
    %104 = math.tanh %103 : vector<8x32xf32>
    %105 = arith.subf %83, %93 : vector<8x32xf32>
    %106 = arith.addf %105, %104 : vector<8x32xf32>
    %107 = vector.broadcast %78 : f32 to vector<8x32xf32>
    %108 = arith.mulf %107, %106 : vector<8x32xf32>
    %109 = arith.addf %69, %108 : vector<8x32xf32>
    %cst_58 = arith.constant dense<0.000000e+00> : vector<8x32xf32>
    %110 = tpu.matmul %109, %18, %cst_58 {dimension_numbers = #tpu.dot_dimension_numbers<[1], [0], [0], [1], [0, 0, 1, 1], [], []>} : vector<8x32xf32>, vector<32x32xf32>, vector<8x32xf32> -> vector<8x32xf32>
    %c1_59 = arith.constant 1 : index
    %c24_60 = arith.constant 24 : index
    %c0_61 = arith.constant 0 : index
    %111 = vector.load %arg18[%c1_59, %c24_60, %c0_61] : memref<6x32x32xf32, #tpu.memory_space<vmem>>, vector<1x8x32xf32>
    %112 = vector.shape_cast %111 : vector<1x8x32xf32> to vector<8x32xf32>
    %113 = arith.addf %110, %112 : vector<8x32xf32>
    %114 = math.tanh %113 : vector<8x32xf32>
    %cst_62 = arith.constant 1.250000e-01 : f32
    %115 = arith.mulf %78, %cst_62 : f32
    %116 = arith.addf %93, %104 : vector<8x32xf32>
    %cst_63 = arith.constant 3.000000e+00 : f32
    %117 = vector.broadcast %cst_63 : f32 to vector<8x32xf32>
    %118 = arith.mulf %117, %116 : vector<8x32xf32>
    %119 = arith.addf %83, %118 : vector<8x32xf32>
    %120 = arith.addf %119, %114 : vector<8x32xf32>
    %121 = vector.broadcast %115 : f32 to vector<8x32xf32>
    %122 = arith.mulf %121, %120 : vector<8x32xf32>
    %123 = arith.addf %69, %122 : vector<8x32xf32>
    %c1_64 = arith.constant 1 : index
    %c0_65 = arith.constant 0 : index
    %c0_66 = arith.constant 0 : index
    %124 = vector.load %arg6[%c1_64, %c0_65, %c0_66] : memref<6x8x1xf32, #tpu.memory_space<vmem>>, vector<1x8x1xf32>
    %125 = vector.shape_cast %124 : vector<1x8x1xf32> to vector<8x1xf32>
    %126 = vector.broadcast %125 : vector<8x1xf32> to vector<8x32xf32>
    %127 = arith.mulf %126, %123 : vector<8x32xf32>
    %128 = arith.addf %74, %127 : vector<8x32xf32>
    %c6_i32_67 = arith.constant 6 : i32
    %129 = arith.muli %arg0, %c6_i32_67 : i32
    %c2_i32 = arith.constant 2 : i32
    %130 = arith.addi %129, %c2_i32 : i32
    %131 = arith.index_cast %130 : i32 to index
    %132 = memref.load %arg14[%131] : memref<12xf32, #tpu.memory_space<smem>>
    %cst_68 = arith.constant dense<0.000000e+00> : vector<8x32xf32>
    %133 = tpu.matmul %123, %18, %cst_68 {dimension_numbers = #tpu.dot_dimension_numbers<[1], [0], [0], [1], [0, 0, 1, 1], [], []>} : vector<8x32xf32>, vector<32x32xf32>, vector<8x32xf32> -> vector<8x32xf32>
    %c2 = arith.constant 2 : index
    %c0_69 = arith.constant 0 : index
    %c0_70 = arith.constant 0 : index
    %134 = vector.load %arg18[%c2, %c0_69, %c0_70] : memref<6x32x32xf32, #tpu.memory_space<vmem>>, vector<1x8x32xf32>
    %135 = vector.shape_cast %134 : vector<1x8x32xf32> to vector<8x32xf32>
    %136 = arith.addf %133, %135 : vector<8x32xf32>
    %137 = math.tanh %136 : vector<8x32xf32>
    %138 = vector.broadcast %132 : f32 to vector<8x32xf32>
    %139 = arith.mulf %138, %137 : vector<8x32xf32>
    %cst_71 = arith.constant 0.333333343 : f32
    %140 = vector.broadcast %cst_71 : f32 to vector<8x32xf32>
    %141 = arith.mulf %139, %140 : vector<8x32xf32>
    %142 = arith.addf %123, %141 : vector<8x32xf32>
    %cst_72 = arith.constant dense<0.000000e+00> : vector<8x32xf32>
    %143 = tpu.matmul %142, %18, %cst_72 {dimension_numbers = #tpu.dot_dimension_numbers<[1], [0], [0], [1], [0, 0, 1, 1], [], []>} : vector<8x32xf32>, vector<32x32xf32>, vector<8x32xf32> -> vector<8x32xf32>
    %c2_73 = arith.constant 2 : index
    %c8_74 = arith.constant 8 : index
    %c0_75 = arith.constant 0 : index
    %144 = vector.load %arg18[%c2_73, %c8_74, %c0_75] : memref<6x32x32xf32, #tpu.memory_space<vmem>>, vector<1x8x32xf32>
    %145 = vector.shape_cast %144 : vector<1x8x32xf32> to vector<8x32xf32>
    %146 = arith.addf %143, %145 : vector<8x32xf32>
    %147 = math.tanh %146 : vector<8x32xf32>
    %cst_76 = arith.constant 0.333333343 : f32
    %148 = vector.broadcast %cst_76 : f32 to vector<8x32xf32>
    %149 = arith.mulf %137, %148 : vector<8x32xf32>
    %150 = arith.subf %147, %149 : vector<8x32xf32>
    %151 = vector.broadcast %132 : f32 to vector<8x32xf32>
    %152 = arith.mulf %151, %150 : vector<8x32xf32>
    %153 = arith.addf %123, %152 : vector<8x32xf32>
    %cst_77 = arith.constant dense<0.000000e+00> : vector<8x32xf32>
    %154 = tpu.matmul %153, %18, %cst_77 {dimension_numbers = #tpu.dot_dimension_numbers<[1], [0], [0], [1], [0, 0, 1, 1], [], []>} : vector<8x32xf32>, vector<32x32xf32>, vector<8x32xf32> -> vector<8x32xf32>
    %c2_78 = arith.constant 2 : index
    %c16_79 = arith.constant 16 : index
    %c0_80 = arith.constant 0 : index
    %155 = vector.load %arg18[%c2_78, %c16_79, %c0_80] : memref<6x32x32xf32, #tpu.memory_space<vmem>>, vector<1x8x32xf32>
    %156 = vector.shape_cast %155 : vector<1x8x32xf32> to vector<8x32xf32>
    %157 = arith.addf %154, %156 : vector<8x32xf32>
    %158 = math.tanh %157 : vector<8x32xf32>
    %159 = arith.subf %137, %147 : vector<8x32xf32>
    %160 = arith.addf %159, %158 : vector<8x32xf32>
    %161 = vector.broadcast %132 : f32 to vector<8x32xf32>
    %162 = arith.mulf %161, %160 : vector<8x32xf32>
    %163 = arith.addf %123, %162 : vector<8x32xf32>
    %cst_81 = arith.constant dense<0.000000e+00> : vector<8x32xf32>
    %164 = tpu.matmul %163, %18, %cst_81 {dimension_numbers = #tpu.dot_dimension_numbers<[1], [0], [0], [1], [0, 0, 1, 1], [], []>} : vector<8x32xf32>, vector<32x32xf32>, vector<8x32xf32> -> vector<8x32xf32>
    %c2_82 = arith.constant 2 : index
    %c24_83 = arith.constant 24 : index
    %c0_84 = arith.constant 0 : index
    %165 = vector.load %arg18[%c2_82, %c24_83, %c0_84] : memref<6x32x32xf32, #tpu.memory_space<vmem>>, vector<1x8x32xf32>
    %166 = vector.shape_cast %165 : vector<1x8x32xf32> to vector<8x32xf32>
    %167 = arith.addf %164, %166 : vector<8x32xf32>
    %168 = math.tanh %167 : vector<8x32xf32>
    %cst_85 = arith.constant 1.250000e-01 : f32
    %169 = arith.mulf %132, %cst_85 : f32
    %170 = arith.addf %147, %158 : vector<8x32xf32>
    %cst_86 = arith.constant 3.000000e+00 : f32
    %171 = vector.broadcast %cst_86 : f32 to vector<8x32xf32>
    %172 = arith.mulf %171, %170 : vector<8x32xf32>
    %173 = arith.addf %137, %172 : vector<8x32xf32>
    %174 = arith.addf %173, %168 : vector<8x32xf32>
    %175 = vector.broadcast %169 : f32 to vector<8x32xf32>
    %176 = arith.mulf %175, %174 : vector<8x32xf32>
    %177 = arith.addf %123, %176 : vector<8x32xf32>
    %c2_87 = arith.constant 2 : index
    %c0_88 = arith.constant 0 : index
    %c0_89 = arith.constant 0 : index
    %178 = vector.load %arg6[%c2_87, %c0_88, %c0_89] : memref<6x8x1xf32, #tpu.memory_space<vmem>>, vector<1x8x1xf32>
    %179 = vector.shape_cast %178 : vector<1x8x1xf32> to vector<8x1xf32>
    %180 = vector.broadcast %179 : vector<8x1xf32> to vector<8x32xf32>
    %181 = arith.mulf %180, %177 : vector<8x32xf32>
    %182 = arith.addf %128, %181 : vector<8x32xf32>
    %c6_i32_90 = arith.constant 6 : i32
    %183 = arith.muli %arg0, %c6_i32_90 : i32
    %c3_i32 = arith.constant 3 : i32
    %184 = arith.addi %183, %c3_i32 : i32
    %185 = arith.index_cast %184 : i32 to index
    %186 = memref.load %arg14[%185] : memref<12xf32, #tpu.memory_space<smem>>
    %cst_91 = arith.constant dense<0.000000e+00> : vector<8x32xf32>
    %187 = tpu.matmul %177, %18, %cst_91 {dimension_numbers = #tpu.dot_dimension_numbers<[1], [0], [0], [1], [0, 0, 1, 1], [], []>} : vector<8x32xf32>, vector<32x32xf32>, vector<8x32xf32> -> vector<8x32xf32>
    %c3 = arith.constant 3 : index
    %c0_92 = arith.constant 0 : index
    %c0_93 = arith.constant 0 : index
    %188 = vector.load %arg18[%c3, %c0_92, %c0_93] : memref<6x32x32xf32, #tpu.memory_space<vmem>>, vector<1x8x32xf32>
    %189 = vector.shape_cast %188 : vector<1x8x32xf32> to vector<8x32xf32>
    %190 = arith.addf %187, %189 : vector<8x32xf32>
    %191 = math.tanh %190 : vector<8x32xf32>
    %192 = vector.broadcast %186 : f32 to vector<8x32xf32>
    %193 = arith.mulf %192, %191 : vector<8x32xf32>
    %cst_94 = arith.constant 0.333333343 : f32
    %194 = vector.broadcast %cst_94 : f32 to vector<8x32xf32>
    %195 = arith.mulf %193, %194 : vector<8x32xf32>
    %196 = arith.addf %177, %195 : vector<8x32xf32>
    %cst_95 = arith.constant dense<0.000000e+00> : vector<8x32xf32>
    %197 = tpu.matmul %196, %18, %cst_95 {dimension_numbers = #tpu.dot_dimension_numbers<[1], [0], [0], [1], [0, 0, 1, 1], [], []>} : vector<8x32xf32>, vector<32x32xf32>, vector<8x32xf32> -> vector<8x32xf32>
    %c3_96 = arith.constant 3 : index
    %c8_97 = arith.constant 8 : index
    %c0_98 = arith.constant 0 : index
    %198 = vector.load %arg18[%c3_96, %c8_97, %c0_98] : memref<6x32x32xf32, #tpu.memory_space<vmem>>, vector<1x8x32xf32>
    %199 = vector.shape_cast %198 : vector<1x8x32xf32> to vector<8x32xf32>
    %200 = arith.addf %197, %199 : vector<8x32xf32>
    %201 = math.tanh %200 : vector<8x32xf32>
    %cst_99 = arith.constant 0.333333343 : f32
    %202 = vector.broadcast %cst_99 : f32 to vector<8x32xf32>
    %203 = arith.mulf %191, %202 : vector<8x32xf32>
    %204 = arith.subf %201, %203 : vector<8x32xf32>
    %205 = vector.broadcast %186 : f32 to vector<8x32xf32>
    %206 = arith.mulf %205, %204 : vector<8x32xf32>
    %207 = arith.addf %177, %206 : vector<8x32xf32>
    %cst_100 = arith.constant dense<0.000000e+00> : vector<8x32xf32>
    %208 = tpu.matmul %207, %18, %cst_100 {dimension_numbers = #tpu.dot_dimension_numbers<[1], [0], [0], [1], [0, 0, 1, 1], [], []>} : vector<8x32xf32>, vector<32x32xf32>, vector<8x32xf32> -> vector<8x32xf32>
    %c3_101 = arith.constant 3 : index
    %c16_102 = arith.constant 16 : index
    %c0_103 = arith.constant 0 : index
    %209 = vector.load %arg18[%c3_101, %c16_102, %c0_103] : memref<6x32x32xf32, #tpu.memory_space<vmem>>, vector<1x8x32xf32>
    %210 = vector.shape_cast %209 : vector<1x8x32xf32> to vector<8x32xf32>
    %211 = arith.addf %208, %210 : vector<8x32xf32>
    %212 = math.tanh %211 : vector<8x32xf32>
    %213 = arith.subf %191, %201 : vector<8x32xf32>
    %214 = arith.addf %213, %212 : vector<8x32xf32>
    %215 = vector.broadcast %186 : f32 to vector<8x32xf32>
    %216 = arith.mulf %215, %214 : vector<8x32xf32>
    %217 = arith.addf %177, %216 : vector<8x32xf32>
    %cst_104 = arith.constant dense<0.000000e+00> : vector<8x32xf32>
    %218 = tpu.matmul %217, %18, %cst_104 {dimension_numbers = #tpu.dot_dimension_numbers<[1], [0], [0], [1], [0, 0, 1, 1], [], []>} : vector<8x32xf32>, vector<32x32xf32>, vector<8x32xf32> -> vector<8x32xf32>
    %c3_105 = arith.constant 3 : index
    %c24_106 = arith.constant 24 : index
    %c0_107 = arith.constant 0 : index
    %219 = vector.load %arg18[%c3_105, %c24_106, %c0_107] : memref<6x32x32xf32, #tpu.memory_space<vmem>>, vector<1x8x32xf32>
    %220 = vector.shape_cast %219 : vector<1x8x32xf32> to vector<8x32xf32>
    %221 = arith.addf %218, %220 : vector<8x32xf32>
    %222 = math.tanh %221 : vector<8x32xf32>
    %cst_108 = arith.constant 1.250000e-01 : f32
    %223 = arith.mulf %186, %cst_108 : f32
    %224 = arith.addf %201, %212 : vector<8x32xf32>
    %cst_109 = arith.constant 3.000000e+00 : f32
    %225 = vector.broadcast %cst_109 : f32 to vector<8x32xf32>
    %226 = arith.mulf %225, %224 : vector<8x32xf32>
    %227 = arith.addf %191, %226 : vector<8x32xf32>
    %228 = arith.addf %227, %222 : vector<8x32xf32>
    %229 = vector.broadcast %223 : f32 to vector<8x32xf32>
    %230 = arith.mulf %229, %228 : vector<8x32xf32>
    %231 = arith.addf %177, %230 : vector<8x32xf32>
    %c3_110 = arith.constant 3 : index
    %c0_111 = arith.constant 0 : index
    %c0_112 = arith.constant 0 : index
    %232 = vector.load %arg6[%c3_110, %c0_111, %c0_112] : memref<6x8x1xf32, #tpu.memory_space<vmem>>, vector<1x8x1xf32>
    %233 = vector.shape_cast %232 : vector<1x8x1xf32> to vector<8x1xf32>
    %234 = vector.broadcast %233 : vector<8x1xf32> to vector<8x32xf32>
    %235 = arith.mulf %234, %231 : vector<8x32xf32>
    %236 = arith.addf %182, %235 : vector<8x32xf32>
    %c6_i32_113 = arith.constant 6 : i32
    %237 = arith.muli %arg0, %c6_i32_113 : i32
    %c4_i32 = arith.constant 4 : i32
    %238 = arith.addi %237, %c4_i32 : i32
    %239 = arith.index_cast %238 : i32 to index
    %240 = memref.load %arg14[%239] : memref<12xf32, #tpu.memory_space<smem>>
    %cst_114 = arith.constant dense<0.000000e+00> : vector<8x32xf32>
    %241 = tpu.matmul %231, %18, %cst_114 {dimension_numbers = #tpu.dot_dimension_numbers<[1], [0], [0], [1], [0, 0, 1, 1], [], []>} : vector<8x32xf32>, vector<32x32xf32>, vector<8x32xf32> -> vector<8x32xf32>
    %c4 = arith.constant 4 : index
    %c0_115 = arith.constant 0 : index
    %c0_116 = arith.constant 0 : index
    %242 = vector.load %arg18[%c4, %c0_115, %c0_116] : memref<6x32x32xf32, #tpu.memory_space<vmem>>, vector<1x8x32xf32>
    %243 = vector.shape_cast %242 : vector<1x8x32xf32> to vector<8x32xf32>
    %244 = arith.addf %241, %243 : vector<8x32xf32>
    %245 = math.tanh %244 : vector<8x32xf32>
    %246 = vector.broadcast %240 : f32 to vector<8x32xf32>
    %247 = arith.mulf %246, %245 : vector<8x32xf32>
    %cst_117 = arith.constant 0.333333343 : f32
    %248 = vector.broadcast %cst_117 : f32 to vector<8x32xf32>
    %249 = arith.mulf %247, %248 : vector<8x32xf32>
    %250 = arith.addf %231, %249 : vector<8x32xf32>
    %cst_118 = arith.constant dense<0.000000e+00> : vector<8x32xf32>
    %251 = tpu.matmul %250, %18, %cst_118 {dimension_numbers = #tpu.dot_dimension_numbers<[1], [0], [0], [1], [0, 0, 1, 1], [], []>} : vector<8x32xf32>, vector<32x32xf32>, vector<8x32xf32> -> vector<8x32xf32>
    %c4_119 = arith.constant 4 : index
    %c8_120 = arith.constant 8 : index
    %c0_121 = arith.constant 0 : index
    %252 = vector.load %arg18[%c4_119, %c8_120, %c0_121] : memref<6x32x32xf32, #tpu.memory_space<vmem>>, vector<1x8x32xf32>
    %253 = vector.shape_cast %252 : vector<1x8x32xf32> to vector<8x32xf32>
    %254 = arith.addf %251, %253 : vector<8x32xf32>
    %255 = math.tanh %254 : vector<8x32xf32>
    %cst_122 = arith.constant 0.333333343 : f32
    %256 = vector.broadcast %cst_122 : f32 to vector<8x32xf32>
    %257 = arith.mulf %245, %256 : vector<8x32xf32>
    %258 = arith.subf %255, %257 : vector<8x32xf32>
    %259 = vector.broadcast %240 : f32 to vector<8x32xf32>
    %260 = arith.mulf %259, %258 : vector<8x32xf32>
    %261 = arith.addf %231, %260 : vector<8x32xf32>
    %cst_123 = arith.constant dense<0.000000e+00> : vector<8x32xf32>
    %262 = tpu.matmul %261, %18, %cst_123 {dimension_numbers = #tpu.dot_dimension_numbers<[1], [0], [0], [1], [0, 0, 1, 1], [], []>} : vector<8x32xf32>, vector<32x32xf32>, vector<8x32xf32> -> vector<8x32xf32>
    %c4_124 = arith.constant 4 : index
    %c16_125 = arith.constant 16 : index
    %c0_126 = arith.constant 0 : index
    %263 = vector.load %arg18[%c4_124, %c16_125, %c0_126] : memref<6x32x32xf32, #tpu.memory_space<vmem>>, vector<1x8x32xf32>
    %264 = vector.shape_cast %263 : vector<1x8x32xf32> to vector<8x32xf32>
    %265 = arith.addf %262, %264 : vector<8x32xf32>
    %266 = math.tanh %265 : vector<8x32xf32>
    %267 = arith.subf %245, %255 : vector<8x32xf32>
    %268 = arith.addf %267, %266 : vector<8x32xf32>
    %269 = vector.broadcast %240 : f32 to vector<8x32xf32>
    %270 = arith.mulf %269, %268 : vector<8x32xf32>
    %271 = arith.addf %231, %270 : vector<8x32xf32>
    %cst_127 = arith.constant dense<0.000000e+00> : vector<8x32xf32>
    %272 = tpu.matmul %271, %18, %cst_127 {dimension_numbers = #tpu.dot_dimension_numbers<[1], [0], [0], [1], [0, 0, 1, 1], [], []>} : vector<8x32xf32>, vector<32x32xf32>, vector<8x32xf32> -> vector<8x32xf32>
    %c4_128 = arith.constant 4 : index
    %c24_129 = arith.constant 24 : index
    %c0_130 = arith.constant 0 : index
    %273 = vector.load %arg18[%c4_128, %c24_129, %c0_130] : memref<6x32x32xf32, #tpu.memory_space<vmem>>, vector<1x8x32xf32>
    %274 = vector.shape_cast %273 : vector<1x8x32xf32> to vector<8x32xf32>
    %275 = arith.addf %272, %274 : vector<8x32xf32>
    %276 = math.tanh %275 : vector<8x32xf32>
    %cst_131 = arith.constant 1.250000e-01 : f32
    %277 = arith.mulf %240, %cst_131 : f32
    %278 = arith.addf %255, %266 : vector<8x32xf32>
    %cst_132 = arith.constant 3.000000e+00 : f32
    %279 = vector.broadcast %cst_132 : f32 to vector<8x32xf32>
    %280 = arith.mulf %279, %278 : vector<8x32xf32>
    %281 = arith.addf %245, %280 : vector<8x32xf32>
    %282 = arith.addf %281, %276 : vector<8x32xf32>
    %283 = vector.broadcast %277 : f32 to vector<8x32xf32>
    %284 = arith.mulf %283, %282 : vector<8x32xf32>
    %285 = arith.addf %231, %284 : vector<8x32xf32>
    %c4_133 = arith.constant 4 : index
    %c0_134 = arith.constant 0 : index
    %c0_135 = arith.constant 0 : index
    %286 = vector.load %arg6[%c4_133, %c0_134, %c0_135] : memref<6x8x1xf32, #tpu.memory_space<vmem>>, vector<1x8x1xf32>
    %287 = vector.shape_cast %286 : vector<1x8x1xf32> to vector<8x1xf32>
    %288 = vector.broadcast %287 : vector<8x1xf32> to vector<8x32xf32>
    %289 = arith.mulf %288, %285 : vector<8x32xf32>
    %290 = arith.addf %236, %289 : vector<8x32xf32>
    %c6_i32_136 = arith.constant 6 : i32
    %291 = arith.muli %arg0, %c6_i32_136 : i32
    %c5_i32 = arith.constant 5 : i32
    %292 = arith.addi %291, %c5_i32 : i32
    %293 = arith.index_cast %292 : i32 to index
    %294 = memref.load %arg14[%293] : memref<12xf32, #tpu.memory_space<smem>>
    %cst_137 = arith.constant dense<0.000000e+00> : vector<8x32xf32>
    %295 = tpu.matmul %285, %18, %cst_137 {dimension_numbers = #tpu.dot_dimension_numbers<[1], [0], [0], [1], [0, 0, 1, 1], [], []>} : vector<8x32xf32>, vector<32x32xf32>, vector<8x32xf32> -> vector<8x32xf32>
    %c5 = arith.constant 5 : index
    %c0_138 = arith.constant 0 : index
    %c0_139 = arith.constant 0 : index
    %296 = vector.load %arg18[%c5, %c0_138, %c0_139] : memref<6x32x32xf32, #tpu.memory_space<vmem>>, vector<1x8x32xf32>
    %297 = vector.shape_cast %296 : vector<1x8x32xf32> to vector<8x32xf32>
    %298 = arith.addf %295, %297 : vector<8x32xf32>
    %299 = math.tanh %298 : vector<8x32xf32>
    %300 = vector.broadcast %294 : f32 to vector<8x32xf32>
    %301 = arith.mulf %300, %299 : vector<8x32xf32>
    %cst_140 = arith.constant 0.333333343 : f32
    %302 = vector.broadcast %cst_140 : f32 to vector<8x32xf32>
    %303 = arith.mulf %301, %302 : vector<8x32xf32>
    %304 = arith.addf %285, %303 : vector<8x32xf32>
    %cst_141 = arith.constant dense<0.000000e+00> : vector<8x32xf32>
    %305 = tpu.matmul %304, %18, %cst_141 {dimension_numbers = #tpu.dot_dimension_numbers<[1], [0], [0], [1], [0, 0, 1, 1], [], []>} : vector<8x32xf32>, vector<32x32xf32>, vector<8x32xf32> -> vector<8x32xf32>
    %c5_142 = arith.constant 5 : index
    %c8_143 = arith.constant 8 : index
    %c0_144 = arith.constant 0 : index
    %306 = vector.load %arg18[%c5_142, %c8_143, %c0_144] : memref<6x32x32xf32, #tpu.memory_space<vmem>>, vector<1x8x32xf32>
    %307 = vector.shape_cast %306 : vector<1x8x32xf32> to vector<8x32xf32>
    %308 = arith.addf %305, %307 : vector<8x32xf32>
    %309 = math.tanh %308 : vector<8x32xf32>
    %cst_145 = arith.constant 0.333333343 : f32
    %310 = vector.broadcast %cst_145 : f32 to vector<8x32xf32>
    %311 = arith.mulf %299, %310 : vector<8x32xf32>
    %312 = arith.subf %309, %311 : vector<8x32xf32>
    %313 = vector.broadcast %294 : f32 to vector<8x32xf32>
    %314 = arith.mulf %313, %312 : vector<8x32xf32>
    %315 = arith.addf %285, %314 : vector<8x32xf32>
    %cst_146 = arith.constant dense<0.000000e+00> : vector<8x32xf32>
    %316 = tpu.matmul %315, %18, %cst_146 {dimension_numbers = #tpu.dot_dimension_numbers<[1], [0], [0], [1], [0, 0, 1, 1], [], []>} : vector<8x32xf32>, vector<32x32xf32>, vector<8x32xf32> -> vector<8x32xf32>
    %c5_147 = arith.constant 5 : index
    %c16_148 = arith.constant 16 : index
    %c0_149 = arith.constant 0 : index
    %317 = vector.load %arg18[%c5_147, %c16_148, %c0_149] : memref<6x32x32xf32, #tpu.memory_space<vmem>>, vector<1x8x32xf32>
    %318 = vector.shape_cast %317 : vector<1x8x32xf32> to vector<8x32xf32>
    %319 = arith.addf %316, %318 : vector<8x32xf32>
    %320 = math.tanh %319 : vector<8x32xf32>
    %321 = arith.subf %299, %309 : vector<8x32xf32>
    %322 = arith.addf %321, %320 : vector<8x32xf32>
    %323 = vector.broadcast %294 : f32 to vector<8x32xf32>
    %324 = arith.mulf %323, %322 : vector<8x32xf32>
    %325 = arith.addf %285, %324 : vector<8x32xf32>
    %cst_150 = arith.constant dense<0.000000e+00> : vector<8x32xf32>
    %326 = tpu.matmul %325, %18, %cst_150 {dimension_numbers = #tpu.dot_dimension_numbers<[1], [0], [0], [1], [0, 0, 1, 1], [], []>} : vector<8x32xf32>, vector<32x32xf32>, vector<8x32xf32> -> vector<8x32xf32>
    %c5_151 = arith.constant 5 : index
    %c24_152 = arith.constant 24 : index
    %c0_153 = arith.constant 0 : index
    %327 = vector.load %arg18[%c5_151, %c24_152, %c0_153] : memref<6x32x32xf32, #tpu.memory_space<vmem>>, vector<1x8x32xf32>
    %328 = vector.shape_cast %327 : vector<1x8x32xf32> to vector<8x32xf32>
    %329 = arith.addf %326, %328 : vector<8x32xf32>
    %330 = math.tanh %329 : vector<8x32xf32>
    %cst_154 = arith.constant 1.250000e-01 : f32
    %331 = arith.mulf %294, %cst_154 : f32
    %332 = arith.addf %309, %320 : vector<8x32xf32>
    %cst_155 = arith.constant 3.000000e+00 : f32
    %333 = vector.broadcast %cst_155 : f32 to vector<8x32xf32>
    %334 = arith.mulf %333, %332 : vector<8x32xf32>
    %335 = arith.addf %299, %334 : vector<8x32xf32>
    %336 = arith.addf %335, %330 : vector<8x32xf32>
    %337 = vector.broadcast %331 : f32 to vector<8x32xf32>
    %338 = arith.mulf %337, %336 : vector<8x32xf32>
    %339 = arith.addf %285, %338 : vector<8x32xf32>
    %c5_156 = arith.constant 5 : index
    %c0_157 = arith.constant 0 : index
    %c0_158 = arith.constant 0 : index
    %340 = vector.load %arg6[%c5_156, %c0_157, %c0_158] : memref<6x8x1xf32, #tpu.memory_space<vmem>>, vector<1x8x1xf32>
    %341 = vector.shape_cast %340 : vector<1x8x1xf32> to vector<8x1xf32>
    %342 = vector.broadcast %341 : vector<8x1xf32> to vector<8x32xf32>
    %343 = arith.mulf %342, %339 : vector<8x32xf32>
    %344 = arith.addf %290, %343 : vector<8x32xf32>
    %c0_159 = arith.constant 0 : index
    %c0_160 = arith.constant 0 : index
    %345 = vector.load %arg16[%c0_159, %c0_160] : memref<8x32xf32, #tpu.memory_space<vmem>>, vector<8x32xf32>
    tpu.vector_store %arg16[%c0_159, %c0_160], %339 {strides = array<i32>} : memref<8x32xf32, #tpu.memory_space<vmem>>, vector<8x32xf32>,
    %c0_161 = arith.constant 0 : index
    %c0_162 = arith.constant 0 : index
    %346 = vector.load %arg17[%c0_161, %c0_162] : memref<8x32xf32, #tpu.memory_space<vmem>>, vector<8x32xf32>
    tpu.vector_store %arg17[%c0_161, %c0_162], %344 {strides = array<i32>} : memref<8x32xf32, #tpu.memory_space<vmem>>, vector<8x32xf32>,
    %c1_i32_163 = arith.constant 1 : i32
    %347 = arith.cmpi eq, %arg0, %c1_i32_163 : i32
    %348 = arith.extui %347 : i1 to i32
    %c0_i32_164 = arith.constant 0 : i32
    %349 = arith.cmpi ne, %348, %c0_i32_164 : i32
    scf.if %349 {
      %c0_165 = arith.constant 0 : index
      %c0_166 = arith.constant 0 : index
      %350 = vector.load %arg12[%c0_165, %c0_166] : memref<32x4xf32, #tpu.memory_space<vmem>>, vector<32x4xf32>
      %cst_167 = arith.constant dense<0.000000e+00> : vector<8x4xf32>
      %351 = tpu.matmul %344, %350, %cst_167 {dimension_numbers = #tpu.dot_dimension_numbers<[1], [0], [0], [1], [0, 0, 1, 1], [], []>} : vector<8x32xf32>, vector<32x4xf32>, vector<8x4xf32> -> vector<8x4xf32>
      %c0_168 = arith.constant 0 : index
      %c0_169 = arith.constant 0 : index
      %352 = vector.load %arg13[%c0_168, %c0_169] : memref<1x4xf32, #tpu.memory_space<vmem>>, vector<1x4xf32>
      %353 = vector.broadcast %352 : vector<1x4xf32> to vector<8x4xf32>
      %354 = arith.addf %351, %353 : vector<8x4xf32>
      %c0_170 = arith.constant 0 : index
      %c0_171 = arith.constant 0 : index
      %355 = vector.load %arg15[%c0_170, %c0_171] : memref<8x4xf32, #tpu.memory_space<vmem>>, vector<8x4xf32>
      tpu.vector_store %arg15[%c0_170, %c0_171], %354 {strides = array<i32>} : memref<8x4xf32, #tpu.memory_space<vmem>>, vector<8x4xf32>,
    } else {
    }
    return
  }
  func.func @transform_0(%arg0: i32) -> (i32, i32, i32) {
    %c0_i32 = arith.constant 0 : i32
    %c0_i32_0 = arith.constant 0 : i32
    %c0_i32_1 = arith.constant 0 : i32
    return %arg0, %c0_i32, %c0_i32_0 : i32, i32, i32
  }
  func.func @transform_1(%arg0: i32) -> (i32, i32, i32) {
    %c0_i32 = arith.constant 0 : i32
    %c0_i32_0 = arith.constant 0 : i32
    %c0_i32_1 = arith.constant 0 : i32
    return %arg0, %c0_i32, %c0_i32_0 : i32, i32, i32
  }
  func.func @transform_2(%arg0: i32) -> (i32, i32, i32) {
    %c0_i32 = arith.constant 0 : i32
    %c0_i32_0 = arith.constant 0 : i32
    %c0_i32_1 = arith.constant 0 : i32
    return %arg0, %c0_i32, %c0_i32_0 : i32, i32, i32
  }
  func.func @transform_3(%arg0: i32) -> (i32, i32, i32) {
    %c0_i32 = arith.constant 0 : i32
    %c0_i32_0 = arith.constant 0 : i32
    %c0_i32_1 = arith.constant 0 : i32
    return %arg0, %c0_i32, %c0_i32_0 : i32, i32, i32
  }
  func.func @transform_4(%arg0: i32) -> (i32, i32, i32) {
    %c0_i32 = arith.constant 0 : i32
    %c0_i32_0 = arith.constant 0 : i32
    %c0_i32_1 = arith.constant 0 : i32
    return %arg0, %c0_i32, %c0_i32_0 : i32, i32, i32
  }
  func.func @transform_5(%arg0: i32) -> (i32, i32, i32) {
    %c0_i32 = arith.constant 0 : i32
    %c0_i32_0 = arith.constant 0 : i32
    %c0_i32_1 = arith.constant 0 : i32
    return %arg0, %c0_i32, %c0_i32_0 : i32, i32, i32
  }
  func.func @transform_6(%arg0: i32) -> (i32, i32) {
    %c0_i32 = arith.constant 0 : i32
    %c0_i32_0 = arith.constant 0 : i32
    %c0_i32_1 = arith.constant 0 : i32
    return %c0_i32, %c0_i32_0 : i32, i32
  }
  func.func @transform_7(%arg0: i32) -> (i32, i32) {
    %c0_i32 = arith.constant 0 : i32
    %c0_i32_0 = arith.constant 0 : i32
    %c0_i32_1 = arith.constant 0 : i32
    return %c0_i32, %c0_i32_0 : i32, i32
  }
  func.func @transform_8(%arg0: i32) -> (i32, i32) {
    %c0_i32 = arith.constant 0 : i32
    %c0_i32_0 = arith.constant 0 : i32
    %c0_i32_1 = arith.constant 0 : i32
    return %c0_i32, %c0_i32_0 : i32, i32
  }
  func.func @transform_9(%arg0: i32) -> (i32, i32) {
    %c0_i32 = arith.constant 0 : i32
    %c0_i32_0 = arith.constant 0 : i32
    %c0_i32_1 = arith.constant 0 : i32
    return %c0_i32, %c0_i32_0 : i32, i32
  }
  func.func @transform_10(%arg0: i32) -> (i32, i32) {
    %c0_i32 = arith.constant 0 : i32
    %c0_i32_0 = arith.constant 0 : i32
    %c0_i32_1 = arith.constant 0 : i32
    return %c0_i32, %c0_i32_0 : i32, i32
  }
  func.func @transform_11(%arg0: i32) -> (i32, i32) {
    %c0_i32 = arith.constant 0 : i32
    %c0_i32_0 = arith.constant 0 : i32
    %c0_i32_1 = arith.constant 0 : i32
    return %c0_i32, %c0_i32_0 : i32, i32
  }
  func.func @transform_12(%arg0: i32) -> (i32, i32) {
    %c0_i32 = arith.constant 0 : i32
    %c0_i32_0 = arith.constant 0 : i32
    %c0_i32_1 = arith.constant 0 : i32
    return %c0_i32, %c0_i32_0 : i32, i32
  }
  func.func @transform_13(%arg0: i32) -> i32 {
    %c0_i32 = arith.constant 0 : i32
    %c0_i32_0 = arith.constant 0 : i32
    return %c0_i32 : i32
  }
  func.func @transform_14(%arg0: i32) -> (i32, i32) {
    %c0_i32 = arith.constant 0 : i32
    %c0_i32_0 = arith.constant 0 : i32
    %c0_i32_1 = arith.constant 0 : i32
    return %c0_i32, %c0_i32_0 : i32, i32
  }
}

</mosaic_0001>

<bundles_post_ra>
// kernel: tpu_custom_call.1
= control target key start
LH: loop header
LB: loop body
LE: loop exit
PB: predicated region body
PF: predicated region fallthrough
CT: control target
= control target key end

     0   :  { %s5078_s0 = inlined_call_operand.vmem [shape: f32[12,32,32], index: 0, kind: input, shape index: {}]   ;;  %s5079_s1 = inlined_call_operand.hbm [shape: f32[12,32,32], index: 1, kind: input, shape index: {}]   ;;  %s5080_s2 = inlined_call_operand.hbm [shape: f32[12,32,32], index: 2, kind: input, shape index: {}]   ;;  %s5081_s3 = inlined_call_operand.hbm [shape: f32[12,32,32], index: 3, kind: input, shape index: {}]   ;;  %s5082_s4 = inlined_call_operand.vmem [shape: f32[12,32,1], index: 4, kind: input, shape index: {}]   ;;  %s5083_s5 = inlined_call_operand.vmem [shape: f32[12,8,1], index: 5, kind: input, shape index: {}]   ;;  %s5084_s6 = inlined_call_operand.vmem [shape: f32[8,1], index: 6, kind: input, shape index: {}]   ;;  %s5085_s7 = inlined_call_operand.vmem [shape: f32[8,6], index: 7, kind: input, shape index: {}]   ;;  %s5086_s8 = inlined_call_operand.vmem [shape: f32[6,32], index: 8, kind: input, shape index: {}]   ;;  %s5087_s9 = inlined_call_operand.vmem [shape: f32[1,32], index: 9, kind: input, shape index: {}]   ;;  %s5088_s10 = inlined_call_operand.vmem [shape: f32[32,32], index: 10, kind: input, shape index: {}]   ;;  %s5089_s11 = inlined_call_operand.vmem [shape: f32[32,4], index: 11, kind: input, shape index: {}]   ;;  %s5090_s12 = inlined_call_operand.vmem [shape: f32[1,4], index: 12, kind: input, shape index: {}]   ;;  %s5091_s13 = inlined_call_operand.vmem [shape: f32[12], index: 13, kind: input, shape index: {}]   ;;  %s5092_s14 = inlined_call_operand.vmem [shape: f32[8,4], index: 14, kind: output, shape index: {}]  }
   0x1   :  { %5106 = sst [smem:[#allocation17_spill]] %s5080_s2 }
   0x2   :  { %5107 = sst [smem:[#allocation18_spill]] %s5088_s10 }
   0x3   :  { %5108 = sst [smem:[#allocation19_spill]] %s5089_s11 }
   0x4   :  { %5109 = sst [smem:[#allocation20_spill]] %s5090_s12 }
   0x5   :  { %5110 = sst [smem:[#allocation21_spill]] %s5091_s13 }
   0x6   :  { %5111 = sst [smem:[#allocation22_spill]] %s5092_s14 }
   0x7   :  { %19 = vsyncpa [#allocation6], 0 }
   0x8   :  { %21 = vsyncpa [#allocation6 + $0x1], 0 }
   0x9   :  { %22 = vsyncpa [#allocation9], 0 }
   0xa   :  { %24 = vsyncpa [#allocation9 + $0x1], 0 }
   0xb   :  { %25 = vsyncpa [#allocation7], 0  ;;  %s4361_s29 = smov 0   ;;  %s4363_s30 = smov 0  }
   0xc   :  { %s4365_s15 = smov 0   ;;  %s4367_s16 = smov 0  }
   0xd LB: > { %s4382_s17 = sadd.s32 1, %s4268_s16   ;;  %s64_s18 = sadd.s32 1, %s4264_s15  ;;  %s4268_s16 = sphi %s4367_s16, %s5134_s16   ;;  %s4264_s15 = sphi %s4365_s15, %s5138_s15   ;;  %s4260_s30 = sphi %s4363_s30, %s5137_s30   ;;  %s4256_s29 = sphi %s4361_s29, %s5136_s29  }
   0xe   : > { %5112 = sst [smem:[#allocation15_spill]] %s4382_s17  ;;  %s61_s19 = ssub.s32 %s4268_s16, %s4382_s17 }
   0xf   : > { %p71_p0 = scmp.ne.s32.totalorder %s4264_s15, %s4260_s30  ;;  %p62_p1 = scmp.eq.s32.totalorder %s61_s19, 0 }
  0x10   : > { %p72_p2 = scmp.eq.s32.totalorder %s4268_s16, 0  ;;  %p4021_p3 = scmp.lt.s32.totalorder %s4268_s16, 2 }
  0x11   : > { %s4392_s20 = scalar_select %p62_p1, %s4264_s15, %s64_s18  }
  0x12   : > { %p73_p4 = por %p72_p2, %p71_p0  ;;  %s5093_s21 = sand.u32 1, %s4264_s15  }
  0x13   : > { %5113 = sst [smem:[#allocation16_spill]] %s4392_s20  ;;  %s4397_s22 = smul.u32 192, %s5093_s21 }
  0x14   : > { %s4400_s23 = smul.u32 3072, %s4268_s16  ;;  %p4402_p5 = pnand %p4021_p3, %p73_p4 }
  0x15   : > { %s458_s25 = sand.u32 1, %s4268_s16   ;;  %s5115_s2 = sld [smem:[#allocation17_spill]] }
  0x16   : > { %s462_s18 = scalar_lea.vmem [#allocation8], %s4397_s22  ;;  %s4416_s21 = scalar_lea.sflag [#allocation9], %s458_s25 }
  0x17   : > { %s470_s19 = sshll.u32 %s462_s18, 4  ;;  %p4422_p7 = pneg %p4402_p5  ;;  %s4414_s19 = int_to_ptr.vmem [resolvable:$true] %s470_s19 }
  0x1b   : > { %s4411_s28 = scalar_lea.hbm %s5115_s2, %s4400_s23  ;;  %s4126_s14 = scalar_lea.hbm %s5115_s2, 6144 }
  0x1c   : > { %s4121_s20 = scalar_lea.hbm %s4411_s28, 3072  ;;  %p4127_p10 = scmp.lt.u32.totalorder %s4411_s28, %s5115_s2 }
  0x1d   : > { %p4122_p6 = scmp.ne.s32.totalorder %s4411_s28, %s4121_s20  ;;  %p4128_p11 = scmp.lt.u32.totalorder %s4126_s14, %s4121_s20 }
  0x1e   : > { %p4130_p13 = scmp.lt.u32.totalorder %s4121_s20, %s4411_s28 }
  0x1f   : > { %p4124_p8 = pnand %p4422_p7, %p4122_p6  ;;  %p4129_p12 = por %p4128_p11, %p4127_p10 }
  0x21   : > { %p4125_p9 = pneg %p4124_p8  ;;  %p4131_p0 = por %p4130_p13, %p4129_p12 }
  0x23   : > { %p4132_p1 = pnand %p4131_p0, %p4125_p9 }
  0x25   : > { %4135 = shalt.err (!%p4132_p1)
}
  0x26   : > { %s4136_s25 = scalar_lea.vmem %s4414_s19, 3072  ;;  %s4270_s26 = smov [#allocation8]  }
  0x27   : > { %p4137_p2 = scmp.ne.s32.totalorder %s4414_s19, %s4136_s25  ;;  %s4141_s27 = sshll.u32 %s4270_s26, 4  ;;  %s4142_s27 = int_to_ptr.vmem [resolvable:$false] %s4141_s27 }
  0x28   : > { %s4143_s12 = scalar_lea.vmem %s4142_s27, 6144  ;;  %p4144_p6 = scmp.lt.s32.totalorder %s4414_s19, %s4142_s27 }
  0x29   : > { %p4139_p3 = pnand %p4137_p2, %p4422_p7  ;;  %p4145_p8 = scmp.lt.s32.totalorder %s4143_s12, %s4136_s25 }
  0x2b   : > { %p4140_p4 = pneg %p4139_p3  ;;  %p4146_p10 = por %p4145_p8, %p4144_p6 }
  0x2d   : > { %p4147_p11 = pnand %p4146_p10, %p4140_p4 }
  0x2f   : > { %4150 = shalt.err (!%p4147_p11)
}
  0x30   : > { %s5096_s14 = smov 128   ;;  %s5098_s20 = smov 8  }
  0x31   : > { %4016 = dma.hbm_to_vmem [thread:$0]  (!%p4402_p5), %s4411_s28, 3072, %s4414_s19, %s4416_s21, %s5096_s14, %s5096_s14, %s5098_s20  }
  0x32   : > { %s4450_s18 = sadd.s32 4294967295, %s4268_s16   ;;  %p77_p9 = scmp.ne.s32.totalorder %s4260_s30, %s4256_s29 }
  0x33   : > { %p5102_p12 = scmp.eq.s32.totalorder %s4450_s18, 0  ;;  %p3370_p13 = scmp.ge.s32.totalorder %s4268_s16, 1 }
  0x34   : > { %p381_p0 = scmp.lt.s32.totalorder %s4268_s16, 3  ;;  %s5118_s13 = sld [smem:[#allocation21_spill]] }
  0x35   : > { %p4460_p2 = por %p5102_p12, %p77_p9  ;;  %s4479_s12 = scalar_lea.hbm %s5079_s1, %s4400_s23 }
  0x36   : > { %p4467_p3 = pnand %p3370_p13, %p381_p0  ;;  %s440_s26 = scalar_lea.vmem [#allocation5], %s4397_s22 }
  0x37   : > { %s5117_s25 = scalar_select %p4460_p2, 1, 0 }
  0x38   : > { %s5119_s27 = scalar_select %p4467_p3, 1, 0 }
  0x39   : > { %p4006_p4 = pneg %p4467_p3  ;;  %s448_s28 = sshll.u32 %s440_s26, 4  ;;  %s4488_s28 = int_to_ptr.vmem [resolvable:$true] %s448_s28 }
  0x3a   : > { %s415_s19 = sshll.u32 %s5118_s13, 4  ;;  %s5121_s20 = sand.u32 1, %s4264_s15   ;;  %s4471_s19 = int_to_ptr.vmem [resolvable:$true] %s415_s19 }
  0x3b   : > { %p4484_p6 = pnand %p4006_p4, %p5102_p12  ;;  %s4492_s2 = scalar_lea.sflag [#allocation6], %s5121_s20 }
  0x3c   : > { %s4151_s13 = scalar_lea.hbm %s4479_s12, 3072  ;;  %s4156_s11 = scalar_lea.hbm %s5079_s1, 6144 }
  0x3d   : > { %s5120_s14 = scalar_select %p4484_p6, 1, 0 }
  0x3e   : > { %p4152_p8 = scmp.ne.s32.totalorder %s4479_s12, %s4151_s13  ;;  %p4157_p9 = scmp.lt.u32.totalorder %s4479_s12, %s5079_s1 }
  0x3f   : > { %p4158_p13 = scmp.lt.u32.totalorder %s4156_s11, %s4151_s13  ;;  %p4160_p4 = scmp.lt.u32.totalorder %s4151_s13, %s4479_s12 }
  0x40   : > { %p4154_p10 = pnand %p4152_p8, %p4422_p7 }
  0x41   : > { %p4159_p0 = por %p4158_p13, %p4157_p9 }
  0x42   : > { %p4155_p11 = pneg %p4154_p10 }
  0x43   : > { %p4161_p1 = por %p4160_p4, %p4159_p0 }
  0x45   : > { %p4162_p12 = pnand %p4161_p1, %p4155_p11 }
  0x47   : > { %4165 = shalt.err (!%p4162_p12)
}
  0x48   : > { %s4166_s20 = scalar_lea.vmem %s4488_s28, 3072  ;;  %s4273_s29 = smov [#allocation5]  }
  0x49   : > { %p4167_p8 = scmp.ne.s32.totalorder %s4488_s28, %s4166_s20  ;;  %s4171_s16 = sshll.u32 %s4273_s29, 4  ;;  %s4172_s16 = int_to_ptr.vmem [resolvable:$false] %s4171_s16 }
  0x4a   : > { %s4173_s10 = scalar_lea.vmem %s4172_s16, 6144  ;;  %p4174_p3 = scmp.lt.s32.totalorder %s4488_s28, %s4172_s16 }
  0x4b   : > { %p4169_p10 = pnand %p4167_p8, %p4422_p7  ;;  %p4175_p6 = scmp.lt.s32.totalorder %s4173_s10, %s4166_s20 }
  0x4d   : > { %p4170_p2 = pneg %p4169_p10  ;;  %p4176_p9 = por %p4175_p6, %p4174_p3 }
  0x4f   : > { %p4177_p13 = pnand %p4176_p9, %p4170_p2 }
  0x51   : > { %4180 = shalt.err (!%p4177_p13)
}
  0x52   : > { %s5122_s11 = smov 8   ;;  %s5123_s13 = smov 128  }
  0x53   : > { %4013 = dma.hbm_to_vmem [thread:$0]  (!%p4402_p5), %s4479_s12, 3072, %s4488_s28, %s4492_s2, %s5123_s13, %s5123_s13, %s5122_s11  }
  0x54   : > { %s4181_s26 = scalar_lea.vmem %s4471_s19, 16  ;;  %p5124_p1 = scmp.ne.s32.totalorder %s5120_s14, 0 }
  0x55   : > { %p4182_p12 = scmp.ne.s32.totalorder %s4471_s19, %s4181_s26  ;;  %p4189_p6 = scmp.lt.s32.totalorder %s4471_s19, %s4471_s19 }
  0x56   : > { %p4183_p11 = pneg %p5124_p1  ;;  %p4190_p0 = scmp.lt.s32.totalorder %s4181_s26, %s4181_s26 }
  0x58   : > { %p4184_p3 = pnand %p4183_p11, %p4182_p12  ;;  %p4191_p4 = por %p4190_p0, %p4189_p6 }
  0x5a   : > { %p4185_p2 = pneg %p4184_p3 }
  0x5c   : > { %p4192_p8 = pnand %p4191_p4, %p4185_p2 }
  0x5e   : > { %4195 = shalt.err (!%p4192_p8)
}
  0x5f   : > { %s4274_s20 = smov [#allocation11]   ;;  %s4532_s28 = scalar_lea.hbm %s5081_s3, %s4400_s23 }
  0x60   : > { %4009 = dma.vmem_to_smem (!%p5124_p1), %s4471_s19, 16, %s4274_s20, [#allocation7]  }
  0x61   : > { %s484_s29 = scalar_lea.vmem [#allocation10], %s4397_s22  ;;  %s4196_s10 = scalar_lea.hbm %s4532_s28, 3072 }
  0x62   : > { %s492_s16 = sshll.u32 %s484_s29, 4  ;;  %p4197_p10 = scmp.ne.s32.totalorder %s4532_s28, %s4196_s10  ;;  %s4535_s16 = int_to_ptr.vmem [resolvable:$true] %s492_s16 }
  0x63   : > { %s4201_s26 = scalar_lea.hbm %s5081_s3, 6144  ;;  %p4202_p12 = scmp.lt.u32.totalorder %s4532_s28, %s5081_s3 }
  0x64   : > { %p4199_p9 = pnand %p4197_p10, %p4422_p7  ;;  %p4203_p1 = scmp.lt.u32.totalorder %s4201_s26, %s4196_s10 }
  0x65   : > { %p4205_p3 = scmp.lt.u32.totalorder %s4196_s10, %s4532_s28 }
  0x66   : > { %p4200_p13 = pneg %p4199_p9  ;;  %p4204_p11 = por %p4203_p1, %p4202_p12 }
  0x68   : > { %p4206_p2 = por %p4205_p3, %p4204_p11 }
  0x6a   : > { %p4207_p6 = pnand %p4206_p2, %p4200_p13 }
  0x6c   : > { %4210 = shalt.err (!%p4207_p6)
}
  0x6d   : > { %s4211_s22 = scalar_lea.vmem %s4535_s16, 3072  ;;  %s4275_s2 = smov [#allocation10]  }
  0x6e   : > { %p4212_p0 = scmp.ne.s32.totalorder %s4535_s16, %s4211_s22  ;;  %s4216_s12 = sshll.u32 %s4275_s2, 4  ;;  %s4217_s12 = int_to_ptr.vmem [resolvable:$false] %s4216_s12 }
  0x6f   : > { %s4218_s29 = scalar_lea.vmem %s4217_s12, 6144  ;;  %p4219_p10 = scmp.lt.s32.totalorder %s4535_s16, %s4217_s12 }
  0x70   : > { %p4214_p4 = pnand %p4212_p0, %p4422_p7  ;;  %p4220_p9 = scmp.lt.s32.totalorder %s4218_s29, %s4211_s22 }
  0x72   : > { %p4215_p8 = pneg %p4214_p4  ;;  %p4221_p12 = por %p4220_p9, %p4219_p10 }
  0x74   : > { %p4222_p1 = pnand %p4221_p12, %p4215_p8 }
  0x76   : > { %4225 = shalt.err (!%p4222_p1)
}
  0x77   : > { %4019 = dma.hbm_to_vmem [thread:$0]  (!%p4402_p5), %s4532_s28, 3072, %s4535_s16, %s4416_s21, %s5123_s13, %s5123_s13, %s5122_s11  }
  0x78   : > { %p5125_p7 = scmp.ne.s32.totalorder %s5119_s27, 0 }
  0x79   : > { %s525_s17 = sand.u32 (!%p5125_p7), 1, %s4260_s30   ;;  %p5126_p13 = scmp.ne.s32.totalorder (!%p5125_p7), %s5117_s25, 0 }
  0x7a   : > { %523 = sbr.rel (%p5125_p7) target bundleno = 6320 (0x18b0), region = 76  ;;  %s526_s14 = scalar_lea.sflag (!%p5125_p7), [#allocation6], %s525_s17 }
  0x7b   : > { %s3995_s10 = smul.u32 (!%p5125_p7), 192, %s525_s17 }
  0x7d   : > { %s4565_s19 = scalar_lea.vmem (!%p5125_p7), [#allocation5], %s3995_s10 }
  0x81   : > { %4243 = dma.done.wait (%p5126_p13), %s526_s14, 3072  }
  0x82   : > { %4245 = vsyncadd (%p5126_p13), %s526_s14, 4294964224  ;;  %s534_s24 = sand.u32 1, %s4450_s18   ;;  %s4572_s21 = scalar_lea.vmem [#allocation8], %s3995_s10 }
  0x83   : > { %s535_s26 = scalar_lea.sflag [#allocation9], %s534_s24 }
  0x84   : > { %4247 = dma.done.wait (%p5126_p13), %s535_s26, 6144  }
  0x85   : > { %4249 = vsyncadd (%p5126_p13), %s535_s26, 4294961152  ;;  %s4578_s27 = scalar_lea.vmem [#allocation10], %s3995_s10  ;;  %p5127_p5 = scmp.eq.s32.totalorder %s4450_s18, 0 }
  0x87   : > { %4251 = dma.done.wait (%p5127_p5), [#allocation7], 16   ;;  %p5128_p11 = pmov %p5127_p5 }
  0x89   : > { %4253 = vsyncadd (%p5128_p11), [#allocation7], 4294967280 }
  0x8a   : > { %556 = sfence }
  0x8b   : > { %s4585_s11 = smul.u32 6, %s4450_s18  ;;  %v4276_v0 = vmov 0   ;;  %v668_v25 = vld [vmem:[%s4578_s27 + $0x10] sm:$0xff]  ;;  %v666_v26 = vld [vmem:[%s4578_s27] sm:$0xff]  ;;  %v669_v33 = vld [vmem:[%s4578_s27 + $0x18] sm:$0xff]  ;;  %vm1026_vm0 = vcmask 261120  }
  0x8c   : > { %4069 = vset.pattern.permute.xlu1 %v4276_v0  ;;  %4068 = vset.pattern.permute.xlu0 %v4276_v0  ;;  %v836_v27 = vld [vmem:[%s4572_s21 + $0x10] sm:$0xff]  ;;  %v834_v29 = vld [vmem:[%s4572_s21] sm:$0xff]  ;;  %v667_v34 = vld [vmem:[%s4578_s27 + $0x8] sm:$0xff]  ;;  %p5129_p2 = scmp.ne.s32.totalorder %s4450_s18, 0 }
  0x8d   : > { %p620_p3 = scmp.lt.s32.totalorder %s4585_s11, 11  ;;  %v908_v35 = vld [vmem:[%s4565_s19 + $0x10] sm:$0xff]  ;;  %v906_v38 = vld [vmem:[%s4565_s19] sm:$0xff]  ;;  %v837_v39 = vld [vmem:[%s4572_s21 + $0x18] sm:$0xff]  ;;  %vm1068_vm1 = vcmask (!%p5129_p2), 1045504   ;;  %vm4278_vm2 = vmmov (!%p5129_p2), 0  }
  0x8e   : > { %v835_v41 = vld [vmem:[%s4572_s21 + $0x8] sm:$0xff]  ;;  %v670_v53 = vld [vmem:[%s4578_s27 + $0x20] sm:$0xff]  ;;  %v909_v55 = vld [vmem:[%s4565_s19 + $0x18] sm:$0xff]  ;;  %vm1064_vm3 = vcmask (!%p5129_p2), 48128  }
  0x8f   : > { %s4591_s25 = scalar_select %p620_p3, %s4585_s11, 11  ;;  %v671_v52 = vld [vmem:[%s4578_s27 + $0x28] sm:$0xff] }
  0x90   : > { %v907_v56 = vld [vmem:[%s4565_s19 + $0x8] sm:$0xff] }
  0x91   : > { %s3430_s13 = sshll.u32 %s4591_s25, 5  ;;  %s3385_s28 = sshll.u32 %s4591_s25, 3  ;;  %v839_v63 = vld [vmem:[%s4572_s21 + $0x28] sm:$0xff] }
  0x92   : > { %s4600_s23 = scalar_lea.vmem %s5082_s4, %s3430_s13  ;;  %s4605_s12 = scalar_lea.vmem %s5083_s5, %s3385_s28 }
  0x93   : > { %v644_v1 = vld [vmem:[%s4600_s23 + $0x10] sm:$0xff]  ;;  %v642_v2 = vld [vmem:[%s4600_s23] sm:$0xff]  ;;  %v645_v3 = vld [vmem:[%s4600_s23 + $0x18] sm:$0xff]  ;;  %s4643_s10 = scalar_lea.vmem %s5078_s0, %s3430_s13 }
  0x94   : > { %702 = vperm.xlu1 %4069, %v644_v1   ;;  %692 = vperm.xlu0 %4068, %v642_v2   ;;  %v643_v4 = vld [vmem:[%s4600_s23 + $0x8] sm:$0xff]  ;;  %v646_v6 = vld [vmem:[%s4600_s23 + $0x20] sm:$0xff]  ;;  %v649_v7 = vld [vmem:[%s4600_s23 + $0x38] sm:$0xff] }
  0x95   : > { %v647_v5 = vld [vmem:[%s4600_s23 + $0x28] sm:$0xff]  ;;  %v648_v8 = vld [vmem:[%s4600_s23 + $0x30] sm:$0xff]  ;;  %v650_v10 = vld [vmem:[%s4600_s23 + $0x40] sm:$0xff] }
  0x96   : > { %v651_v9 = vld [vmem:[%s4600_s23 + $0x48] sm:$0xff]  ;;  %v653_v11 = vld [vmem:[%s4600_s23 + $0x58] sm:$0xff]  ;;  %v652_v12 = vld [vmem:[%s4600_s23 + $0x50] sm:$0xff] }
  0x97   : > { %v655_v13 = vld [vmem:[%s4600_s23 + $0x68] sm:$0xff]  ;;  %v654_v14 = vld [vmem:[%s4600_s23 + $0x60] sm:$0xff]  ;;  %v657_v15 = vld [vmem:[%s4600_s23 + $0x78] sm:$0xff] }
  0x98   : > { %707 = vperm.xlu1 %4069, %v645_v3   ;;  %697 = vperm.xlu0 %4068, %v643_v4   ;;  %v656_v16 = vld [vmem:[%s4600_s23 + $0x70] sm:$0xff]  ;;  %v659_v17 = vld [vmem:[%s4600_s23 + $0x88] sm:$0xff]  ;;  %v658_v18 = vld [vmem:[%s4600_s23 + $0x80] sm:$0xff] }
  0x99   : > { %v661_v19 = vld [vmem:[%s4600_s23 + $0x98] sm:$0xff]  ;;  %v660_v20 = vld [vmem:[%s4600_s23 + $0x90] sm:$0xff]  ;;  %v663_v21 = vld [vmem:[%s4600_s23 + $0xa8] sm:$0xff] }
  0x9a   : > { %v662_v22 = vld [vmem:[%s4600_s23 + $0xa0] sm:$0xff]  ;;  %v665_v23 = vld [vmem:[%s4600_s23 + $0xb8] sm:$0xff]  ;;  %v664_v24 = vld [vmem:[%s4600_s23 + $0xb0] sm:$0xff] }
  0x9b   : > { %v980_v48 = vld [vmem:[%s4643_s10 + $0x10] sm:$0xff]  ;;  %v978_v54 = vld [vmem:[%s4643_s10] sm:$0xff]  ;;  %v673_v4 = vld [vmem:[%s4578_s27 + $0x38] sm:$0xff] }
  0x9c   : > { %717 = vperm.xlu1 %4069, %v647_v5   ;;  %712 = vperm.xlu0 %4068, %v646_v6   ;;  %v838_v1 = vld [vmem:[%s4572_s21 + $0x20] sm:$0xff]  ;;  %v672_v5 = vld [vmem:[%s4578_s27 + $0x30] sm:$0xff] }
  0xa0   : > { %727 = vperm.xlu1 %4069, %v649_v7   ;;  %722 = vperm.xlu0 %4068, %v648_v8  }
  0xa4   : > { %737 = vperm.xlu1 %4069, %v651_v9   ;;  %732 = vperm.xlu0 %4068, %v650_v10   ;;  %v981_v9 = vld [vmem:[%s4643_s10 + $0x18] sm:$0xff] }
  0xa8   : > { %747 = vperm.xlu1 %4069, %v653_v11   ;;  %742 = vperm.xlu0 %4068, %v652_v12   ;;  %v979_v11 = vld [vmem:[%s4643_s10 + $0x8] sm:$0xff] }
  0xac   : > { %757 = vperm.xlu1 %4069, %v655_v13   ;;  %752 = vperm.xlu0 %4068, %v654_v14   ;;  %v841_v14 = vld [vmem:[%s4572_s21 + $0x38] sm:$0xff] }
  0xb0   : > { %767 = vperm.xlu1 %4069, %v657_v15   ;;  %762 = vperm.xlu0 %4068, %v656_v16   ;;  %v840_v16 = vld [vmem:[%s4572_s21 + $0x30] sm:$0xff] }
  0xb4   : > { %777 = vperm.xlu1 %4069, %v659_v17   ;;  %772 = vperm.xlu0 %4068, %v658_v18  }
  0xb8   : > { %787 = vperm.xlu1 %4069, %v661_v19   ;;  %782 = vperm.xlu0 %4068, %v660_v20   ;;  %v911_v20 = vld [vmem:[%s4565_s19 + $0x28] sm:$0xff] }
  0xbc   : > { %797 = vperm.xlu1 %4069, %v663_v21   ;;  %792 = vperm.xlu0 %4068, %v662_v22   ;;  %v910_v21 = vld [vmem:[%s4565_s19 + $0x20] sm:$0xff] }
  0xc0   : > { %807 = vperm.xlu1 %4069, %v665_v23   ;;  %802 = vperm.xlu0 %4068, %v664_v24  }
 0x113   : > { %v703_v28 = vpop.permute.xlu1 %702  ;;  %v693_v30 = vpop.permute.xlu0 %692 }
 0x114   : > { %v812_v31 = vmul.f32 %v703_v28, %v668_v25  ;;  %v810_v32 = vmul.f32 %v693_v30, %v666_v26  ;;  %v675_v26 = vld [vmem:[%s4578_s27 + $0x48] sm:$0xff] }
 0x116   : > { %v860_v36 = vadd.f32 %v836_v27, %v812_v31  ;;  %v858_v37 = vadd.f32 %v834_v29, %v810_v32  ;;  %v674_v27 = vld [vmem:[%s4578_s27 + $0x40] sm:$0xff] }
 0x117   : > { %v708_v40 = vpop.permute.xlu1 %707  ;;  %v698_v42 = vpop.permute.xlu0 %697 }
 0x118   : > { %v884_v43 = vmul.f32 %v860_v36, %v703_v28  ;;  %v882_v44 = vmul.f32 %v858_v37, %v693_v30  ;;  %v813_v45 = vmul.f32 %v708_v40, %v669_v33  ;;  %v811_v46 = vmul.f32 %v698_v42, %v667_v34  ;;  %v843_v36 = vld [vmem:[%s4572_s21 + $0x48] sm:$0xff] }
 0x11a   : > { %v932_v47 = vadd.f32 %v908_v35, %v884_v43  ;;  %v930_v49 = vadd.f32 %v906_v38, %v882_v44  ;;  %v861_v50 = vadd.f32 %v837_v39, %v813_v45  ;;  %v859_v51 = vadd.f32 %v835_v41, %v811_v46  ;;  %v912_v35 = vld [vmem:[%s4565_s19 + $0x30] sm:$0xff]  ;;  %v842_v38 = vld [vmem:[%s4572_s21 + $0x40] sm:$0xff] }
 0x11b   : > { %v718_v57 = vpop.permute.xlu1 %717  ;;  %v713_v58 = vpop.permute.xlu0 %712  ;;  %v982_v41 = vld [vmem:[%s4643_s10 + $0x20] sm:$0xff] }
 0x11c   : > { %v956_v59 = vmul.f32 %v932_v47, %v703_v28  ;;  %v954_v60 = vmul.f32 %v930_v49, %v693_v30  ;;  %v885_v61 = vmul.f32 %v861_v50, %v708_v40  ;;  %v883_v62 = vmul.f32 %v859_v51, %v698_v42  ;;  %v913_v30 = vld [vmem:[%s4565_s19 + $0x38] sm:$0xff]  ;;  %v985_v49 = vld [vmem:[%s4643_s10 + $0x38] sm:$0xff] }
 0x11d   : > { %v815_v2 = vmul.f32 %v718_v57, %v671_v52  ;;  %v814_v3 = vmul.f32 %v713_v58, %v670_v53  ;;  %v677_v53 = vld [vmem:[%s4578_s27 + $0x58] sm:$0xff] }
 0x11e   : > { %v1004_v6 = vadd.f32 %v980_v48, %v956_v59  ;;  %v1002_v7 = vadd.f32 %v978_v54, %v954_v60  ;;  %v933_v8 = vadd.f32 %v909_v55, %v885_v61  ;;  %v931_v10 = vadd.f32 %v907_v56, %v883_v62  ;;  %v676_v54 = vld [vmem:[%s4578_s27 + $0x50] sm:$0xff]  ;;  %v984_v59 = vld [vmem:[%s4643_s10 + $0x30] sm:$0xff]  ;;  %v915_v60 = vld [vmem:[%s4565_s19 + $0x48] sm:$0xff] }
 0x11f   : > { %v863_v12 = vadd.f32 %v839_v63, %v815_v2  ;;  %v862_v13 = vadd.f32 %v838_v1, %v814_v3  ;;  %v728_v15 = vpop.permute.xlu1 %727  ;;  %v723_v17 = vpop.permute.xlu0 %722  ;;  %v914_v61 = vld [vmem:[%s4565_s19 + $0x40] sm:$0xff]  ;;  %v845_v3 = vld [vmem:[%s4572_s21 + $0x58] sm:$0xff] }
 0x120   : > { %1029 = vst.msk [vmem:[#allocation4 + $0x10] sm:$0xff] %vm1026_vm0, %v1004_v6  ;;  %1027 = vst.msk [vmem:[#allocation4] sm:$0xff] %vm1026_vm0, %v1002_v7  ;;  %v957_v18 = vmul.f32 %v933_v8, %v708_v40  ;;  %v955_v19 = vmul.f32 %v931_v10, %v698_v42  ;;  %v817_v22 = vmul.f32 %v728_v15, %v673_v4  ;;  %v983_v40 = vld [vmem:[%s4643_s10 + $0x28] sm:$0xff]  ;;  %v844_v4 = vld [vmem:[%s4572_s21 + $0x50] sm:$0xff] }
 0x121   : > { %v816_v23 = vmul.f32 %v723_v17, %v672_v5  ;;  %v887_v24 = vmul.f32 %v863_v12, %v718_v57  ;;  %v886_v25 = vmul.f32 %v862_v13, %v713_v58  ;;  %v679_v7 = vld [vmem:[%s4578_s27 + $0x68] sm:$0xff]  ;;  %v678_v8 = vld [vmem:[%s4578_s27 + $0x60] sm:$0xff]  ;;  %v987_v12 = vld [vmem:[%s4643_s10 + $0x48] sm:$0xff] }
 0x122   : > { %v1005_v28 = vadd.f32 %v981_v9, %v957_v18  ;;  %v1003_v29 = vadd.f32 %v979_v11, %v955_v19  ;;  %v865_v31 = vadd.f32 %v841_v14, %v817_v22  ;;  %v986_v14 = vld [vmem:[%s4643_s10 + $0x40] sm:$0xff]  ;;  %v846_v19 = vld [vmem:[%s4572_s21 + $0x60] sm:$0xff] }
 0x123   : > { %v864_v32 = vadd.f32 %v840_v16, %v816_v23  ;;  %v935_v33 = vadd.f32 %v911_v20, %v887_v24  ;;  %v934_v34 = vadd.f32 %v910_v21, %v886_v25  ;;  %v738_v37 = vpop.permute.xlu1 %737  ;;  %v733_v39 = vpop.permute.xlu0 %732  ;;  %v917_v23 = vld [vmem:[%s4565_s19 + $0x58] sm:$0xff]  ;;  %v916_v24 = vld [vmem:[%s4565_s19 + $0x50] sm:$0xff] }
 0x124   : > { %1030 = vst.msk [vmem:[#allocation4 + $0x18] sm:$0xff] %vm1026_vm0, %v1005_v28  ;;  %1028 = vst.msk [vmem:[#allocation4 + $0x8] sm:$0xff] %vm1026_vm0, %v1003_v29  ;;  %v889_v42 = vmul.f32 %v865_v31, %v728_v15  ;;  %v819_v44 = vmul.f32 %v738_v37, %v675_v26  ;;  %v818_v45 = vmul.f32 %v733_v39, %v674_v27  ;;  %v681_v29 = vld [vmem:[%s4578_s27 + $0x78] sm:$0xff] }
 0x125   : > { %v888_v43 = vmul.f32 %v864_v32, %v723_v17  ;;  %v959_v46 = vmul.f32 %v935_v33, %v718_v57  ;;  %v958_v47 = vmul.f32 %v934_v34, %v713_v58  ;;  %v919_v33 = vld [vmem:[%s4565_s19 + $0x68] sm:$0xff] }
 0x126   : > { %v937_v48 = vadd.f32 %v913_v30, %v889_v42  ;;  %v867_v51 = vadd.f32 %v843_v36, %v819_v44  ;;  %v866_v52 = vadd.f32 %v842_v38, %v818_v45  ;;  %v680_v30 = vld [vmem:[%s4578_s27 + $0x70] sm:$0xff]  ;;  %v918_v38 = vld [vmem:[%s4565_s19 + $0x60] sm:$0xff] }
 0x127   : > { %v936_v50 = vadd.f32 %v912_v35, %v888_v43  ;;  %v1007_v55 = vadd.f32 %v983_v40, %v959_v46  ;;  %v1006_v56 = vadd.f32 %v982_v41, %v958_v47  ;;  %v748_v62 = vpop.permute.xlu1 %747  ;;  %v743_v63 = vpop.permute.xlu0 %742  ;;  %v848_v41 = vld [vmem:[%s4572_s21 + $0x70] sm:$0xff]  ;;  %v989_v43 = vld [vmem:[%s4643_s10 + $0x58] sm:$0xff]  ;;  %v988_v44 = vld [vmem:[%s4643_s10 + $0x50] sm:$0xff] }
 0x128   : > { %v961_v57 = vmul.f32 %v937_v48, %v728_v15  ;;  %v891_v1 = vmul.f32 %v867_v51, %v738_v37  ;;  %v890_v2 = vmul.f32 %v866_v52, %v733_v39  ;;  %v821_v5 = vmul.f32 %v748_v62, %v677_v53  ;;  %v991_v52 = vld [vmem:[%s4643_s10 + $0x68] sm:$0xff] }
 0x129   : > { %v960_v58 = vmul.f32 %v936_v50, %v723_v17  ;;  %1032 = vst.msk [vmem:[#allocation4 + $0x28] sm:$0xff] %vm1026_vm0, %v1007_v55  ;;  %1031 = vst.msk [vmem:[#allocation4 + $0x20] sm:$0xff] %vm1026_vm0, %v1006_v56  ;;  %v820_v6 = vmul.f32 %v743_v63, %v676_v54  ;;  %v847_v17 = vld [vmem:[%s4572_s21 + $0x68] sm:$0xff] }
 0x12a   : > { %v1009_v9 = vadd.f32 %v985_v49, %v961_v57  ;;  %v939_v11 = vadd.f32 %v915_v60, %v891_v1  ;;  %v938_v13 = vadd.f32 %v914_v61, %v890_v2  ;;  %v869_v15 = vadd.f32 %v845_v3, %v821_v5  ;;  %v683_v56 = vld [vmem:[%s4578_s27 + $0x88] sm:$0xff]  ;;  %v990_v57 = vld [vmem:[%s4643_s10 + $0x60] sm:$0xff] }
 0x12b   : > { %v1008_v10 = vadd.f32 %v984_v59, %v960_v58  ;;  %v868_v16 = vadd.f32 %v844_v4, %v820_v6  ;;  %v758_v18 = vpop.permute.xlu1 %757  ;;  %v753_v20 = vpop.permute.xlu0 %752  ;;  %v682_v59 = vld [vmem:[%s4578_s27 + $0x80] sm:$0xff]  ;;  %v921_v58 = vld [vmem:[%s4565_s19 + $0x78] sm:$0xff]  ;;  %v920_v1 = vld [vmem:[%s4565_s19 + $0x70] sm:$0xff] }
 0x12c   : > { %1034 = vst.msk [vmem:[#allocation4 + $0x38] sm:$0xff] %vm1026_vm0, %v1009_v9  ;;  %v963_v21 = vmul.f32 %v939_v11, %v738_v37  ;;  %v962_v22 = vmul.f32 %v938_v13, %v733_v39  ;;  %v823_v25 = vmul.f32 %v758_v18, %v679_v7  ;;  %v822_v26 = vmul.f32 %v753_v20, %v678_v8  ;;  %v849_v39 = vld [vmem:[%s4572_s21 + $0x78] sm:$0xff]  ;;  %v851_v6 = vld [vmem:[%s4572_s21 + $0x88] sm:$0xff]  ;;  %v850_v7 = vld [vmem:[%s4572_s21 + $0x80] sm:$0xff] }
 0x12d   : > { %1033 = vst.msk [vmem:[#allocation4 + $0x30] sm:$0xff] %vm1026_vm0, %v1008_v10  ;;  %v893_v27 = vmul.f32 %v869_v15, %v748_v62  ;;  %v892_v28 = vmul.f32 %v868_v16, %v743_v63  ;;  %v685_v10 = vld [vmem:[%s4578_s27 + $0x98] sm:$0xff]  ;;  %v684_v11 = vld [vmem:[%s4578_s27 + $0x90] sm:$0xff]  ;;  %v993_v15 = vld [vmem:[%s4643_s10 + $0x78] sm:$0xff] }
 0x12e   : > { %v1011_v31 = vadd.f32 %v987_v12, %v963_v21  ;;  %v1010_v32 = vadd.f32 %v986_v14, %v962_v22  ;;  %v871_v34 = vadd.f32 %v847_v17, %v823_v25  ;;  %v870_v35 = vadd.f32 %v846_v19, %v822_v26  ;;  %v992_v17 = vld [vmem:[%s4643_s10 + $0x70] sm:$0xff]  ;;  %v852_v22 = vld [vmem:[%s4572_s21 + $0x90] sm:$0xff]  ;;  %v923_v26 = vld [vmem:[%s4565_s19 + $0x88] sm:$0xff] }
 0x12f   : > { %v941_v36 = vadd.f32 %v917_v23, %v893_v27  ;;  %v940_v37 = vadd.f32 %v916_v24, %v892_v28  ;;  %v768_v40 = vpop.permute.xlu1 %767  ;;  %v763_v42 = vpop.permute.xlu0 %762  ;;  %v922_v27 = vld [vmem:[%s4565_s19 + $0x80] sm:$0xff] }
 0x130   : > { %1036 = vst.msk [vmem:[#allocation4 + $0x48] sm:$0xff] %vm1026_vm0, %v1011_v31  ;;  %1035 = vst.msk [vmem:[#allocation4 + $0x40] sm:$0xff] %vm1026_vm0, %v1010_v32  ;;  %v895_v45 = vmul.f32 %v871_v34, %v758_v18  ;;  %v894_v46 = vmul.f32 %v870_v35, %v753_v20  ;;  %v825_v47 = vmul.f32 %v768_v40, %v681_v29  ;;  %v687_v32 = vld [vmem:[%s4578_s27 + $0xa8] sm:$0xff] }
 0x131   : > { %v824_v48 = vmul.f32 %v763_v42, %v680_v30  ;;  %v965_v49 = vmul.f32 %v941_v36, %v748_v62  ;;  %v964_v50 = vmul.f32 %v940_v37, %v743_v63  ;;  %v925_v36 = vld [vmem:[%s4565_s19 + $0x98] sm:$0xff] }
 0x132   : > { %v943_v51 = vadd.f32 %v919_v33, %v895_v45  ;;  %v942_v53 = vadd.f32 %v918_v38, %v894_v46  ;;  %v873_v54 = vadd.f32 %v849_v39, %v825_v47  ;;  %v686_v33 = vld [vmem:[%s4578_s27 + $0xa0] sm:$0xff]  ;;  %v995_v46 = vld [vmem:[%s4643_s10 + $0x88] sm:$0xff]  ;;  %v994_v47 = vld [vmem:[%s4643_s10 + $0x80] sm:$0xff] }
 0x133   : > { %v872_v55 = vadd.f32 %v848_v41, %v824_v48  ;;  %v1013_v60 = vadd.f32 %v989_v43, %v965_v49  ;;  %v1012_v61 = vadd.f32 %v988_v44, %v964_v50  ;;  %v778_v2 = vpop.permute.xlu1 %777  ;;  %v773_v3 = vpop.permute.xlu0 %772  ;;  %v924_v41 = vld [vmem:[%s4565_s19 + $0x90] sm:$0xff]  ;;  %v854_v44 = vld [vmem:[%s4572_s21 + $0xa0] sm:$0xff] }
 0x134   : > { %v967_v62 = vmul.f32 %v943_v51, %v758_v18  ;;  %v966_v63 = vmul.f32 %v942_v53, %v753_v20  ;;  %v897_v4 = vmul.f32 %v873_v54, %v768_v40  ;;  %v827_v8 = vmul.f32 %v778_v2, %v683_v56  ;;  %v853_v20 = vld [vmem:[%s4572_s21 + $0x98] sm:$0xff] }
 0x135   : > { %v896_v5 = vmul.f32 %v872_v55, %v763_v42  ;;  %1038 = vst.msk [vmem:[#allocation4 + $0x58] sm:$0xff] %vm1026_vm0, %v1013_v60  ;;  %1037 = vst.msk [vmem:[#allocation4 + $0x50] sm:$0xff] %vm1026_vm0, %v1012_v61  ;;  %v826_v9 = vmul.f32 %v773_v3, %v682_v59  ;;  %v997_v55 = vld [vmem:[%s4643_s10 + $0x98] sm:$0xff]  ;;  %v689_v61 = vld [vmem:[%s4578_s27 + $0xb8] sm:$0xff] }
 0x136   : > { %v1015_v12 = vadd.f32 %v991_v52, %v967_v62  ;;  %v1014_v13 = vadd.f32 %v990_v57, %v966_v63  ;;  %v945_v14 = vadd.f32 %v921_v58, %v897_v4  ;;  %v875_v18 = vadd.f32 %v851_v6, %v827_v8  ;;  %v688_v57 = vld [vmem:[%s4578_s27 + $0xb0] sm:$0xff]  ;;  %v996_v62 = vld [vmem:[%s4643_s10 + $0x90] sm:$0xff]  ;;  %v927_v63 = vld [vmem:[%s4565_s19 + $0xa8] sm:$0xff] }
 0x137   : > { %v944_v16 = vadd.f32 %v920_v1, %v896_v5  ;;  %v874_v19 = vadd.f32 %v850_v7, %v826_v9  ;;  %v788_v21 = vpop.permute.xlu1 %787  ;;  %v783_v23 = vpop.permute.xlu0 %782  ;;  %v926_v4 = vld [vmem:[%s4565_s19 + $0xa0] sm:$0xff]  ;;  %v857_v9 = vld [vmem:[%s4572_s21 + $0xb8] sm:$0xff] }
 0x138   : > { %1040 = vst.msk [vmem:[#allocation4 + $0x68] sm:$0xff] %vm1026_vm0, %v1015_v12  ;;  %1039 = vst.msk [vmem:[#allocation4 + $0x60] sm:$0xff] %vm1026_vm0, %v1014_v13  ;;  %v969_v24 = vmul.f32 %v945_v14, %v768_v40  ;;  %v829_v28 = vmul.f32 %v788_v21, %v685_v10  ;;  %v828_v29 = vmul.f32 %v783_v23, %v684_v11  ;;  %v856_v10 = vld [vmem:[%s4572_s21 + $0xb0] sm:$0xff] }
 0x139   : > { %v968_v25 = vmul.f32 %v944_v16, %v763_v42  ;;  %v899_v30 = vmul.f32 %v875_v18, %v778_v2  ;;  %v898_v31 = vmul.f32 %v874_v19, %v773_v3  ;;  %v855_v42 = vld [vmem:[%s4572_s21 + $0xa8] sm:$0xff]  ;;  %v998_v18 = vld [vmem:[%s4643_s10 + $0xa0] sm:$0xff] }
 0x13a   : > { %v1017_v34 = vadd.f32 %v993_v15, %v969_v24  ;;  %v877_v37 = vadd.f32 %v853_v20, %v829_v28  ;;  %v876_v38 = vadd.f32 %v852_v22, %v828_v29  ;;  %v928_v24 = vld [vmem:[%s4565_s19 + $0xb0] sm:$0xff] }
 0x13b   : > { %v1016_v35 = vadd.f32 %v992_v17, %v968_v25  ;;  %v947_v39 = vadd.f32 %v923_v26, %v899_v30  ;;  %v946_v40 = vadd.f32 %v922_v27, %v898_v31  ;;  %v798_v43 = vpop.permute.xlu1 %797  ;;  %v793_v45 = vpop.permute.xlu0 %792  ;;  %v999_v17 = vld [vmem:[%s4643_s10 + $0xa8] sm:$0xff]  ;;  %v1001_v31 = vld [vmem:[%s4643_s10 + $0xb8] sm:$0xff] }
 0x13c   : > { %1042 = vst.msk [vmem:[#allocation4 + $0x78] sm:$0xff] %vm1026_vm0, %v1017_v34  ;;  %v901_v48 = vmul.f32 %v877_v37, %v788_v21  ;;  %v900_v49 = vmul.f32 %v876_v38, %v783_v23  ;;  %v831_v50 = vmul.f32 %v798_v43, %v687_v32  ;;  %v830_v51 = vmul.f32 %v793_v45, %v686_v33  ;;  %v1000_v32 = vld [vmem:[%s4643_s10 + $0xb0] sm:$0xff]  ;;  %v1056_v37 = vld [vmem:[%s5086_s8] sm:$0x3f] (!%p5129_p2) }
 0x13d   : > { %1041 = vst.msk [vmem:[#allocation4 + $0x70] sm:$0xff] %vm1026_vm0, %v1016_v35  ;;  %v971_v52 = vmul.f32 %v947_v39, %v778_v2  ;;  %v970_v53 = vmul.f32 %v946_v40, %v773_v3  ;;  %v1055_v38 = vld [vmem:[%s5085_s7] sm:$0xff] (!%p5129_p2)  ;;  %v4277_v39 = vmov (!%p5129_p2), 0.0  }
 0x13e   : > { %v949_v54 = vadd.f32 %v925_v36, %v901_v48  ;;  %v948_v56 = vadd.f32 %v924_v41, %v900_v49  ;;  %v879_v59 = vadd.f32 %v855_v42, %v831_v50  ;;  %v878_v60 = vadd.f32 %v854_v44, %v830_v51  ;;  %3562 = vmatprep.subr.mxu0 (!%p5129_p2), %v4277_v39  ;;  %v1143_v40 = vld [vmem:[%s5084_s6] sm:$0xff] (!%p5129_p2) }
 0x13f   : > { %v1019_v58 = vadd.f32 %v995_v46, %v971_v52  ;;  %v1018_v1 = vadd.f32 %v994_v47, %v970_v53  ;;  %v808_v5 = vpop.permute.xlu1 %807  ;;  %v803_v6 = vpop.permute.xlu0 %802  ;;  %3564 = vmatprep.mubr.msk.f32.mxu0 (!%p5129_p2), %vm4278_vm2, %v4277_v39  ;;  %3563 = vmatpush3.msk.msra.mxu0 (!%p5129_p2), %vm1068_vm1, %v1056_v37  ;;  %v4279_v41 = vmov (!%p5129_p2), 0   ;;  %v3387_v42 = vld [vmem:[%s5087_s9] ss:$0 sm:$0xff] (!%p5129_p2) }
 0x140   : > { %v973_v2 = vmul.f32 %v949_v54, %v788_v21  ;;  %v972_v3 = vmul.f32 %v948_v56, %v783_v23  ;;  %v903_v7 = vmul.f32 %v879_v59, %v798_v43  ;;  %v902_v8 = vmul.f32 %v878_v60, %v793_v45  ;;  %v929_v23 = vld [vmem:[%s4565_s19 + $0xb8] sm:$0xff]  ;;  %4070 = vset.pattern.permute.xlu0 (!%p5129_p2), %v4279_v41 }
 0x141   : > { %1044 = vst.msk [vmem:[#allocation4 + $0x88] sm:$0xff] %vm1026_vm0, %v1019_v58  ;;  %1043 = vst.msk [vmem:[#allocation4 + $0x80] sm:$0xff] %vm1026_vm0, %v1018_v1  ;;  %v833_v11 = vmul.f32 %v808_v5, %v689_v61  ;;  %v832_v12 = vmul.f32 %v803_v6, %v688_v57  ;;  %3565 = vmatmul.mubr.msk.f32.vlgmr.msra.gmra.mrb[0].mxu0 (!%p5129_p2), %vm1064_vm3, %v1055_v38  ;;  %1146 = vperm.xlu0 (!%p5129_p2), %4070, %v1143_v40  }
 0x142   : > { %v1021_v13 = vadd.f32 %v997_v55, %v973_v2  ;;  %v1020_v14 = vadd.f32 %v996_v62, %v972_v3  ;;  %v951_v15 = vadd.f32 %v927_v63, %v903_v7  ;;  %v950_v16 = vadd.f32 %v926_v4, %v902_v8 }
 0x143   : > { %v881_v19 = vadd.f32 %v857_v9, %v833_v11  ;;  %v880_v20 = vadd.f32 %v856_v10, %v832_v12 }
 0x144   : > { %1046 = vst.msk [vmem:[#allocation4 + $0x98] sm:$0xff] %vm1026_vm0, %v1021_v13  ;;  %1045 = vst.msk [vmem:[#allocation4 + $0x90] sm:$0xff] %vm1026_vm0, %v1020_v14  ;;  %v975_v21 = vmul.f32 %v951_v15, %v798_v43  ;;  %v974_v22 = vmul.f32 %v950_v16, %v793_v45 }
 0x145   : > { %v905_v25 = vmul.f32 %v881_v19, %v808_v5  ;;  %v904_v26 = vmul.f32 %v880_v20, %v803_v6 }
 0x146   : > { %v1023_v27 = vadd.f32 %v999_v17, %v975_v21  ;;  %v1022_v28 = vadd.f32 %v998_v18, %v974_v22 }
 0x147   : > { %v953_v29 = vadd.f32 %v929_v23, %v905_v25  ;;  %v952_v30 = vadd.f32 %v928_v24, %v904_v26  ;;  %1054 = sbr.rel (%p5129_p2) target bundleno = 538 (0x21a), region = 96 }
 0x148   : > { %1048 = vst.msk [vmem:[#allocation4 + $0xa8] sm:$0xff] %vm1026_vm0, %v1023_v27  ;;  %1047 = vst.msk [vmem:[#allocation4 + $0xa0] sm:$0xff] %vm1026_vm0, %v1022_v28 }
 0x149   : > { %v977_v33 = vmul.f32 %v953_v29, %v808_v5  ;;  %v976_v34 = vmul.f32 %v952_v30, %v803_v6 }
 0x14b   : > { %v1025_v35 = vadd.f32 %v1001_v31, %v977_v33  ;;  %v1024_v36 = vadd.f32 %v1000_v32, %v976_v34 }
 0x14d   : > { %1050 = vst.msk [vmem:[#allocation4 + $0xb8] sm:$0xff] %vm1026_vm0, %v1025_v35  ;;  %1049 = vst.msk [vmem:[#allocation4 + $0xb0] sm:$0xff] %vm1026_vm0, %v1024_v36 }
 0x1c0   : > { %v1147_v44 = vpop.permute.xlu0 %1146 }
 0x214   : > { %v1138_v43 = vpop.f32.mrb[0].mxu0 }
 0x215   : > { %v1139_v45 = vadd.f32 %v3387_v42, %v1138_v43  ;;  %v3566_v46 = vpop.f32.mrb[1].mxu0 }
 0x217   : > { %1142 = vst.msk [vmem:[#allocation2] sm:$0xff] %vm1026_vm0, %v1139_v45  ;;  %v1149_v47 = vmul.f32 %v1147_v44, %v1139_v45 }
 0x219   : > { %1150 = vst.msk [vmem:[#allocation3] sm:$0xff] %vm1026_vm0, %v1149_v47 }
 0x21a PF: > { %s5130_s20 = sld [smem:[#allocation18_spill]]  ;;  %4071 = vset.pattern.permute.xlu0 %v4276_v0  ;;  %4072 = vset.pattern.permute.xlu1 %v4276_v0  ;;  %v4280_v51 = vmov 0.0|0.0   ;;  %vm4281_vm4 = vmmov 0   ;;  %v4282_v54 = vmov 0.0   ;;  %v1159_v56 = vld [vmem:[#allocation4] sm:$0xff]  ;;  %v1238_v4 = vld [vmem:[#allocation4 + $0x8] sm:$0xff] }
 0x21b   : > { %3842 = vmatprep.subr.bf16.mxu0 %v4280_v51  ;;  %3575 = vmatprep.mubr.msk.f32.mxu0 %vm4281_vm4, %v4282_v54  ;;  %s4817_s14 = sld [smem:[#allocation11 + %s4585_s11]]  ;;  %v1479_v11 = vld [vmem:[%s4605_s12] sm:$0xff]  ;;  %v1396_v21 = vld [vmem:[#allocation4 + $0x18] sm:$0xff]  ;;  %v1490_v33 = vld [vmem:[#allocation4 + $0x20] sm:$0xff]  ;;  %s1487_s24 = sadd.s32 1, %s4585_s11 }
 0x21c   : > { %3848 = vmatprep.subr.bf16.mxu1 %v4280_v51  ;;  %3586 = vmatprep.mubr.msk.f32.mxu1 %vm4281_vm4, %v4282_v54  ;;  %v1317_v12 = vld [vmem:[#allocation4 + $0x10] sm:$0xff]  ;;  %s4858_s26 = sld [smem:[#allocation11 + %s1487_s24]]  ;;  %v1569_v42 = vld [vmem:[#allocation4 + $0x28] sm:$0xff]  ;;  %s1819_s27 = sadd.s32 2, %s4585_s11 }
 0x21d   : > { %1482 = vperm.xlu0 %4071, %v1479_v11   ;;  %s4899_s25 = sld [smem:[#allocation11 + %s1819_s27]]  ;;  %s2151_s28 = sadd.s32 3, %s4585_s11 }
 0x21e   : > { %v4803_v55 = vld [vmem:[#allocation2] sm:$0xff]  ;;  %s4940_s16 = sld [smem:[#allocation11 + %s2151_s28]]  ;;  %s2483_s22 = sadd.s32 4, %s4585_s11 }
 0x21f   : > { %s4981_s2 = sld [smem:[#allocation11 + %s2483_s22]]  ;;  %s2815_s17 = sadd.s32 5, %s4585_s11 }
 0x220   : > { %v1151_v48 = vld [vmem:[%s5130_s20] sm:$0xff]  ;;  %v1152_v49 = vld [vmem:[%s5130_s20 + $0x8] sm:$0xff]  ;;  %v1153_v50 = vld [vmem:[%s5130_s20 + $0x10] sm:$0xff]  ;;  %s5021_s10 = sld [smem:[#allocation11 + %s2815_s17]]  ;;  %p3419_p6 = scmp.ne.s32.totalorder %s4450_s18, 1 }
 0x221   : > { %v4786_v52 = vpack.c.bf16 %v1152_v49, %v1151_v48  ;;  %v1154_v53 = vld [vmem:[%s5130_s20 + $0x18] sm:$0xff]  ;;  %v1234_v57 = vstv %s4817_s14  ;;  %s1471_s19 = smul.f32 0.125, %s4817_s14  ;;  %vm4284_vm5 = vmmov (!%p3419_p6), 0   ;;  %vm3237_vm6 = vcmask (!%p3419_p6), 31744  }
 0x222   : > { %v4797_v0 = vpack.c.bf16 %v1154_v53, %v1153_v50  ;;  %v1565_v37 = vstv %s4858_s26  ;;  %v3398_v53 = vld [vmem:[%s4605_s12 + $0x8] sm:$0xff]  ;;  %s1802_s21 = smul.f32 0.125, %s4858_s26 }
 0x223   : > { %3844 = vmatpush3.bf16.msra.mxu0 %v4786_v52  ;;  %3850 = vmatpush3.bf16.msra.mxu1 %v4786_v52  ;;  %v1476_v29 = vstv %s1471_s19  ;;  %s2134_s13 = smul.f32 0.125, %s4899_s25  ;;  %s5131_s19 = sld [smem:[#allocation19_spill]] (!%p3419_p6) }
 0x224   : > { %3845 = vmatprep.subr.bf16.mxu0 %v4280_v51  ;;  %3851 = vmatprep.subr.bf16.mxu1 %v4280_v51  ;;  %s2466_s23 = smul.f32 0.125, %s4940_s16 }
 0x225   : > { %1814 = vperm.xlu0 %4071, %v3398_v53   ;;  %s2798_s29 = smul.f32 0.125, %s4981_s2 }
 0x226   : > { %s3130_s11 = smul.f32 0.125, %s5021_s10 }
 0x227   : > { %3847 = vmatpush3.bf16.msra.mxu0 %v4797_v0  ;;  %3853 = vmatpush3.bf16.msra.mxu1 %v4797_v0 }
 0x228   : > { %3854 = vmatprep.subr.bf16.mxu0 %v4280_v51  ;;  %3860 = vmatprep.subr.bf16.mxu1 %v4280_v51 }
 0x22a   : > { %3576 = vmatmul.mubr.msk.f32.vlgmr.msra.gmra.mrb[0].mxu0 %vm1026_vm0, %v4803_v55 }
 0x22b   : > { %3856 = vmatpush3.bf16.msra.mxu0 %v4786_v52  ;;  %3597 = vmatprep.mubr.msk.f32.mxu0 %vm4281_vm4, %v4282_v54 }
 0x22c   : > { %3857 = vmatprep.subr.bf16.mxu0 %v4280_v51 }
 0x22f   : > { %3859 = vmatpush3.bf16.msra.mxu0 %v4797_v0 }
 0x230   : > { %3866 = vmatprep.subr.bf16.mxu0 %v4280_v51 }
 0x2fd   : > { %v1229_v59 = vpop.f32.mrb[0].mxu0 }
 0x2fe   : > { %v1230_v60 = vadd.f32 %v1229_v59, %v1159_v56  ;;  %v3577_v61 = vpop.f32.mrb[1].mxu0 }
 0x300   : > { %4073 = vtanh.f32 %v1230_v60 }
 0x30a   : > { %v4074_v58 = vpop.eup %4073 }
 0x30b   : > { %v1235_v1 = vmul.f32 %v4074_v58, %v1234_v57  ;;  %v1313_v3 = vmul.f32 0.33333334, %v4074_v58 }
 0x30d   : > { %v1236_v62 = vmul.f32 0.33333334, %v1235_v1 }
 0x30f   : > { %v1237_v63 = vadd.f32 %v1236_v62, %v4803_v55 }
 0x311   : > { %3587 = vmatmul.mubr.msk.f32.vlgmr.msra.gmra.mrb[0].mxu1 %vm1026_vm0, %v1237_v63  ;;  %v1727_v63 = vld [vmem:[#allocation4 + $0x38] sm:$0xff] }
 0x312   : > { %3862 = vmatpush3.bf16.msra.mxu1 %v4786_v52  ;;  %3608 = vmatprep.mubr.msk.f32.mxu1 %vm4281_vm4, %v4282_v54 }
 0x313   : > { %3863 = vmatprep.subr.bf16.mxu1 %v4280_v51 }
 0x316   : > { %3865 = vmatpush3.bf16.msra.mxu1 %v4797_v0 }
 0x317   : > { %3872 = vmatprep.subr.bf16.mxu1 %v4280_v51 }
 0x3e4   : > { %v1308_v5 = vpop.f32.mrb[0].mxu1 }
 0x3e5   : > { %v1309_v6 = vadd.f32 %v1308_v5, %v1238_v4  ;;  %v3588_v2 = vpop.f32.mrb[1].mxu1 }
 0x3e7   : > { %4075 = vtanh.f32 %v1309_v6 }
 0x3f1   : > { %v4076_v7 = vpop.eup %4075 }
 0x3f2   : > { %v1314_v8 = vsub.f32 %v4076_v7, %v1313_v3  ;;  %v1392_v16 = vsub.f32 %v4074_v58, %v4076_v7 }
 0x3f4   : > { %v1315_v9 = vmul.f32 %v1314_v8, %v1234_v57 }
 0x3f6   : > { %v1316_v10 = vadd.f32 %v1315_v9, %v4803_v55  ;;  %v1807_v9 = vstv %s1802_s21 }
 0x3f8   : > { %3598 = vmatmul.mubr.msk.f32.vlgmr.msra.gmra.mrb[2].mxu0 %vm1026_vm0, %v1316_v10 }
 0x3f9   : > { %3868 = vmatpush3.bf16.msra.mxu0 %v4786_v52  ;;  %3619 = vmatprep.mubr.msk.f32.mxu0 %vm4281_vm4, %v4282_v54 }
 0x3fa   : > { %3869 = vmatprep.subr.bf16.mxu0 %v4280_v51 }
 0x3fd   : > { %3871 = vmatpush3.bf16.msra.mxu0 %v4797_v0 }
 0x3fe   : > { %3878 = vmatprep.subr.bf16.mxu0 %v4280_v51 }
 0x4cb   : > { %v1387_v13 = vpop.f32.mrb[2].mxu0 }
 0x4cc   : > { %v1388_v14 = vadd.f32 %v1387_v13, %v1317_v12  ;;  %v3599_v15 = vpop.f32.mrb[3].mxu0  ;;  %v1822_v13 = vld [vmem:[#allocation4 + $0x40] sm:$0xff] }
 0x4ce   : > { %4077 = vtanh.f32 %v1388_v14 }
 0x4d8   : > { %v4078_v17 = vpop.eup %4077 }
 0x4d9   : > { %v1393_v18 = vadd.f32 %v4078_v17, %v1392_v16  ;;  %v1472_v25 = vadd.f32 %v4078_v17, %v4076_v7  ;;  %v1897_v17 = vstv %s4899_s25 }
 0x4db   : > { %v1394_v19 = vmul.f32 %v1393_v18, %v1234_v57  ;;  %v1473_v26 = vmul.f32 3.0, %v1472_v25 }
 0x4dd   : > { %v1395_v20 = vadd.f32 %v1394_v19, %v4803_v55  ;;  %v1474_v27 = vadd.f32 %v4074_v58, %v1473_v26 }
 0x4df   : > { %3609 = vmatmul.mubr.msk.f32.vlgmr.msra.gmra.mrb[2].mxu1 %vm1026_vm0, %v1395_v20 }
 0x4e0   : > { %3874 = vmatpush3.bf16.msra.mxu1 %v4786_v52  ;;  %3630 = vmatprep.mubr.msk.f32.mxu1 %vm4281_vm4, %v4282_v54 }
 0x4e1   : > { %3875 = vmatprep.subr.bf16.mxu1 %v4280_v51 }
 0x4e4   : > { %3877 = vmatpush3.bf16.msra.mxu1 %v4797_v0 }
 0x4e5   : > { %3884 = vmatprep.subr.bf16.mxu1 %v4280_v51 }
 0x5b2   : > { %v1466_v22 = vpop.f32.mrb[2].mxu1 }
 0x5b3   : > { %v1467_v23 = vadd.f32 %v1466_v22, %v1396_v21  ;;  %v3610_v24 = vpop.f32.mrb[3].mxu1  ;;  %v1901_v22 = vld [vmem:[#allocation4 + $0x48] sm:$0xff] }
 0x5b5   : > { %4079 = vtanh.f32 %v1467_v23 }
 0x5bf   : > { %v4080_v28 = vpop.eup %4079 }
 0x5c0   : > { %v1475_v30 = vadd.f32 %v4080_v28, %v1474_v27 }
 0x5c2   : > { %v1477_v31 = vmul.f32 %v1476_v29, %v1475_v30 }
 0x5c4   : > { %v4847_v32 = vadd.f32 %v1477_v31, %v4803_v55  ;;  %v1648_v55 = vld [vmem:[#allocation4 + $0x30] sm:$0xff]  ;;  %v3403_v31 = vld [vmem:[%s4605_s12 + $0x10] sm:$0xff] }
 0x5c5   : > { %2146 = vperm.xlu1 %4072, %v3403_v31   ;;  %v2471_v31 = vstv %s2466_s23 }
 0x5c6   : > { %3620 = vmatmul.mubr.msk.f32.vlgmr.msra.gmra.mrb[4].mxu0 %vm1026_vm0, %v4847_v32 }
 0x5c7   : > { %3880 = vmatpush3.bf16.msra.mxu0 %v4786_v52  ;;  %3641 = vmatprep.mubr.msk.f32.mxu0 %vm4281_vm4, %v4282_v54 }
 0x5c8   : > { %3881 = vmatprep.subr.bf16.mxu0 %v4280_v51 }
 0x5cb   : > { %3883 = vmatpush3.bf16.msra.mxu0 %v4797_v0 }
 0x5cc   : > { %3890 = vmatprep.subr.bf16.mxu0 %v4280_v51 }
 0x699   : > { %v1560_v34 = vpop.f32.mrb[4].mxu0 }
 0x69a   : > { %v1561_v35 = vadd.f32 %v1560_v34, %v1490_v33  ;;  %v3621_v36 = vpop.f32.mrb[5].mxu0  ;;  %v1980_v33 = vld [vmem:[#allocation4 + $0x50] sm:$0xff] }
 0x69c   : > { %4081 = vtanh.f32 %v1561_v35 }
 0x6a6   : > { %v4082_v38 = vpop.eup %4081 }
 0x6a7   : > { %v1566_v39 = vmul.f32 %v4082_v38, %v1565_v37  ;;  %v1644_v46 = vmul.f32 0.33333334, %v4082_v38 }
 0x6a9   : > { %v1567_v40 = vmul.f32 0.33333334, %v1566_v39 }
 0x6ab   : > { %v1568_v41 = vadd.f32 %v1567_v40, %v4847_v32 }
 0x6ad   : > { %3631 = vmatmul.mubr.msk.f32.vlgmr.msra.gmra.mrb[4].mxu1 %vm1026_vm0, %v1568_v41 }
 0x6ae   : > { %3886 = vmatpush3.bf16.msra.mxu1 %v4786_v52  ;;  %3652 = vmatprep.mubr.msk.f32.mxu1 %vm4281_vm4, %v4282_v54 }
 0x6af   : > { %3887 = vmatprep.subr.bf16.mxu1 %v4280_v51 }
 0x6b2   : > { %3889 = vmatpush3.bf16.msra.mxu1 %v4797_v0 }
 0x6b3   : > { %3896 = vmatprep.subr.bf16.mxu1 %v4280_v51 }
 0x780   : > { %v1639_v43 = vpop.f32.mrb[4].mxu1 }
 0x781   : > { %v1640_v44 = vadd.f32 %v1639_v43, %v1569_v42  ;;  %v3632_v45 = vpop.f32.mrb[5].mxu1  ;;  %v2059_v42 = vld [vmem:[#allocation4 + $0x58] sm:$0xff] }
 0x783   : > { %4083 = vtanh.f32 %v1640_v44 }
 0x78d   : > { %v4084_v47 = vpop.eup %4083 }
 0x78e   : > { %v1645_v48 = vsub.f32 %v4084_v47, %v1644_v46  ;;  %v1723_v61 = vsub.f32 %v4082_v38, %v4084_v47 }
 0x790   : > { %v1646_v49 = vmul.f32 %v1645_v48, %v1565_v37 }
 0x792   : > { %v1647_v50 = vadd.f32 %v1646_v49, %v4847_v32 }
 0x794   : > { %3642 = vmatmul.mubr.msk.f32.vlgmr.msra.gmra.mrb[6].mxu0 %vm1026_vm0, %v1647_v50  ;;  %v2139_v50 = vstv %s2134_s13 }
 0x795   : > { %3892 = vmatpush3.bf16.msra.mxu0 %v4786_v52  ;;  %3663 = vmatprep.mubr.msk.f32.mxu0 %vm4281_vm4, %v4282_v54 }
 0x796   : > { %3893 = vmatprep.subr.bf16.mxu0 %v4280_v51 }
 0x799   : > { %3895 = vmatpush3.bf16.msra.mxu0 %v4797_v0 }
 0x79a   : > { %3902 = vmatprep.subr.bf16.mxu0 %v4280_v51 }
 0x867   : > { %v1718_v56 = vpop.f32.mrb[6].mxu0 }
 0x868   : > { %v1719_v59 = vadd.f32 %v1718_v56, %v1648_v55  ;;  %v3643_v60 = vpop.f32.mrb[7].mxu0 }
 0x86a   : > { %4085 = vtanh.f32 %v1719_v59  ;;  %v2154_v59 = vld [vmem:[#allocation4 + $0x60] sm:$0xff] }
 0x874   : > { %v4086_v57 = vpop.eup %4085 }
 0x875   : > { %v1724_v58 = vadd.f32 %v4086_v57, %v1723_v61  ;;  %v1803_v2 = vadd.f32 %v4086_v57, %v4084_v47 }
 0x877   : > { %v1725_v1 = vmul.f32 %v1724_v58, %v1565_v37  ;;  %v1804_v3 = vmul.f32 3.0, %v1803_v2  ;;  %v2229_v58 = vstv %s4940_s16  ;;  %s5132_s16 = sld [smem:[#allocation20_spill]] (!%p3419_p6) }
 0x879   : > { %v1726_v62 = vadd.f32 %v1725_v1, %v4847_v32  ;;  %v1805_v7 = vadd.f32 %v4082_v38, %v1804_v3 }
 0x87b   : > { %3653 = vmatmul.mubr.msk.f32.vlgmr.msra.gmra.mrb[6].mxu1 %vm1026_vm0, %v1726_v62 }
 0x87c   : > { %3898 = vmatpush3.bf16.msra.mxu1 %v4786_v52  ;;  %3674 = vmatprep.mubr.msk.f32.mxu1 %vm4281_vm4, %v4282_v54 }
 0x87d   : > { %3899 = vmatprep.subr.bf16.mxu1 %v4280_v51 }
 0x880   : > { %3901 = vmatpush3.bf16.msra.mxu1 %v4797_v0 }
 0x881   : > { %3908 = vmatprep.subr.bf16.mxu1 %v4280_v51 }
 0x94e   : > { %v1797_v4 = vpop.f32.mrb[6].mxu1 }
 0x94f   : > { %v1798_v5 = vadd.f32 %v1797_v4, %v1727_v63  ;;  %v3654_v6 = vpop.f32.mrb[7].mxu1 }
 0x951   : > { %4087 = vtanh.f32 %v1798_v5  ;;  %v2233_v5 = vld [vmem:[#allocation4 + $0x68] sm:$0xff] }
 0x95b   : > { %v4088_v8 = vpop.eup %4087 }
 0x95c   : > { %v1806_v10 = vadd.f32 %v4088_v8, %v1805_v7 }
 0x95e   : > { %v1808_v11 = vmul.f32 %v1807_v9, %v1806_v10 }
 0x960   : > { %v4888_v12 = vadd.f32 %v1808_v11, %v4847_v32 }
 0x962   : > { %3664 = vmatmul.mubr.msk.f32.vlgmr.msra.gmra.mrb[8].mxu0 %vm1026_vm0, %v4888_v12 }
 0x963   : > { %3904 = vmatpush3.bf16.msra.mxu0 %v4786_v52  ;;  %3685 = vmatprep.mubr.msk.f32.mxu0 %vm4281_vm4, %v4282_v54 }
 0x964   : > { %3905 = vmatprep.subr.bf16.mxu0 %v4280_v51 }
 0x967   : > { %3907 = vmatpush3.bf16.msra.mxu0 %v4797_v0 }
 0x968   : > { %3914 = vmatprep.subr.bf16.mxu0 %v4280_v51 }
 0xa35   : > { %v1892_v14 = vpop.f32.mrb[8].mxu0 }
 0xa36   : > { %v1893_v15 = vadd.f32 %v1892_v14, %v1822_v13  ;;  %v3665_v16 = vpop.f32.mrb[9].mxu0  ;;  %v3408_v13 = vld [vmem:[%s4605_s12 + $0x18] sm:$0xff]  ;;  %v2312_v14 = vld [vmem:[#allocation4 + $0x70] sm:$0xff] }
 0xa37   : > { %2478 = vperm.xlu1 %4072, %v3408_v13  }
 0xa38   : > { %4089 = vtanh.f32 %v1893_v15 }
 0xa42   : > { %v4090_v18 = vpop.eup %4089 }
 0xa43   : > { %v1898_v19 = vmul.f32 %v4090_v18, %v1897_v17  ;;  %v1976_v26 = vmul.f32 0.33333334, %v4090_v18 }
 0xa45   : > { %v1899_v20 = vmul.f32 0.33333334, %v1898_v19 }
 0xa47   : > { %v1900_v21 = vadd.f32 %v1899_v20, %v4888_v12 }
 0xa49   : > { %3675 = vmatmul.mubr.msk.f32.vlgmr.msra.gmra.mrb[8].mxu1 %vm1026_vm0, %v1900_v21 }
 0xa4a   : > { %3910 = vmatpush3.bf16.msra.mxu1 %v4786_v52  ;;  %3696 = vmatprep.mubr.msk.f32.mxu1 %vm4281_vm4, %v4282_v54 }
 0xa4b   : > { %3911 = vmatprep.subr.bf16.mxu1 %v4280_v51 }
 0xa4e   : > { %3913 = vmatpush3.bf16.msra.mxu1 %v4797_v0 }
 0xa4f   : > { %3920 = vmatprep.subr.bf16.mxu1 %v4280_v51 }
 0xb1c   : > { %v1971_v23 = vpop.f32.mrb[8].mxu1 }
 0xb1d   : > { %v1972_v24 = vadd.f32 %v1971_v23, %v1901_v22  ;;  %v3676_v25 = vpop.f32.mrb[9].mxu1  ;;  %v2391_v23 = vld [vmem:[#allocation4 + $0x78] sm:$0xff] }
 0xb1f   : > { %4091 = vtanh.f32 %v1972_v24 }
 0xb29   : > { %v4092_v27 = vpop.eup %4091 }
 0xb2a   : > { %v1977_v28 = vsub.f32 %v4092_v27, %v1976_v26  ;;  %v2055_v37 = vsub.f32 %v4090_v18, %v4092_v27 }
 0xb2c   : > { %v1978_v29 = vmul.f32 %v1977_v28, %v1897_v17 }
 0xb2e   : > { %v1979_v30 = vadd.f32 %v1978_v29, %v4888_v12 }
 0xb30   : > { %3686 = vmatmul.mubr.msk.f32.vlgmr.msra.gmra.mrb[10].mxu0 %vm1026_vm0, %v1979_v30 }
 0xb31   : > { %3916 = vmatpush3.bf16.msra.mxu0 %v4786_v52  ;;  %3707 = vmatprep.mubr.msk.f32.mxu0 %vm4281_vm4, %v4282_v54 }
 0xb32   : > { %3917 = vmatprep.subr.bf16.mxu0 %v4280_v51 }
 0xb35   : > { %3919 = vmatpush3.bf16.msra.mxu0 %v4797_v0 }
 0xb36   : > { %3926 = vmatprep.subr.bf16.mxu0 %v4280_v51 }
 0xc03   : > { %v2050_v34 = vpop.f32.mrb[10].mxu0 }
 0xc04   : > { %v2051_v35 = vadd.f32 %v2050_v34, %v1980_v33  ;;  %v3687_v36 = vpop.f32.mrb[11].mxu0 }
 0xc05   : > { %v2486_v36 = vld [vmem:[#allocation4 + $0x80] sm:$0xff] }
 0xc06   : > { %4093 = vtanh.f32 %v2051_v35 }
 0xc10   : > { %v4094_v38 = vpop.eup %4093 }
 0xc11   : > { %v2056_v39 = vadd.f32 %v4094_v38, %v2055_v37  ;;  %v2135_v46 = vadd.f32 %v4094_v38, %v4092_v27 }
 0xc13   : > { %v2057_v40 = vmul.f32 %v2056_v39, %v1897_v17  ;;  %v2136_v47 = vmul.f32 3.0, %v2135_v46 }
 0xc15   : > { %v2058_v41 = vadd.f32 %v2057_v40, %v4888_v12  ;;  %v2137_v48 = vadd.f32 %v4090_v18, %v2136_v47  ;;  %v2561_v40 = vstv %s4981_s2  ;;  %s5133_s2 = sld [smem:[#allocation22_spill]] (!%p3419_p6) }
 0xc17   : > { %3697 = vmatmul.mubr.msk.f32.vlgmr.msra.gmra.mrb[10].mxu1 %vm1026_vm0, %v2058_v41 }
 0xc18   : > { %3922 = vmatpush3.bf16.msra.mxu1 %v4786_v52  ;;  %3718 = vmatprep.mubr.msk.f32.mxu1 %vm4281_vm4, %v4282_v54 }
 0xc19   : > { %3923 = vmatprep.subr.bf16.mxu1 %v4280_v51 }
 0xc1c   : > { %3925 = vmatpush3.bf16.msra.mxu1 %v4797_v0 }
 0xc1d   : > { %3932 = vmatprep.subr.bf16.mxu1 %v4280_v51 }
 0xcea   : > { %v2129_v43 = vpop.f32.mrb[10].mxu1 }
 0xceb   : > { %v2130_v44 = vadd.f32 %v2129_v43, %v2059_v42  ;;  %v3698_v45 = vpop.f32.mrb[11].mxu1 }
 0xcec   : > { %v2565_v45 = vld [vmem:[#allocation4 + $0x88] sm:$0xff] }
 0xced   : > { %4095 = vtanh.f32 %v2130_v44 }
 0xcf7   : > { %v4096_v49 = vpop.eup %4095 }
 0xcf8   : > { %v2138_v53 = vadd.f32 %v4096_v49, %v2137_v48 }
 0xcfa   : > { %v2140_v55 = vmul.f32 %v2139_v50, %v2138_v53 }
 0xcfc   : > { %v4929_v56 = vadd.f32 %v2140_v55, %v4888_v12 }
 0xcfe   : > { %3708 = vmatmul.mubr.msk.f32.vlgmr.msra.gmra.mrb[12].mxu0 %vm1026_vm0, %v4929_v56 }
 0xcff   : > { %3928 = vmatpush3.bf16.msra.mxu0 %v4786_v52  ;;  %3729 = vmatprep.mubr.msk.f32.mxu0 %vm4281_vm4, %v4282_v54 }
 0xd00   : > { %3929 = vmatprep.subr.bf16.mxu0 %v4280_v51 }
 0xd03   : > { %3931 = vmatpush3.bf16.msra.mxu0 %v4797_v0 }
 0xd04   : > { %3938 = vmatprep.subr.bf16.mxu0 %v4280_v51 }
 0xdd1   : > { %v2224_v60 = vpop.f32.mrb[12].mxu0 }
 0xdd2   : > { %v2225_v61 = vadd.f32 %v2224_v60, %v2154_v59  ;;  %v3709_v57 = vpop.f32.mrb[13].mxu0  ;;  %v3413_v60 = vld [vmem:[%s4605_s12 + $0x20] sm:$0xff] }
 0xdd3   : > { %2810 = vperm.xlu0 %4071, %v3413_v60   ;;  %v1156_v60 = vld [vmem:[#allocation3] sm:$0xff] }
 0xdd4   : > { %4097 = vtanh.f32 %v2225_v61  ;;  %v2644_v61 = vld [vmem:[#allocation4 + $0x90] sm:$0xff] }
 0xdde   : > { %v4098_v1 = vpop.eup %4097 }
 0xddf   : > { %v2230_v62 = vmul.f32 %v4098_v1, %v2229_v58  ;;  %v2308_v7 = vmul.f32 0.33333334, %v4098_v1 }
 0xde1   : > { %v2231_v63 = vmul.f32 0.33333334, %v2230_v62 }
 0xde3   : > { %v2232_v4 = vadd.f32 %v2231_v63, %v4929_v56 }
 0xde5   : > { %3719 = vmatmul.mubr.msk.f32.vlgmr.msra.gmra.mrb[12].mxu1 %vm1026_vm0, %v2232_v4 }
 0xde6   : > { %3934 = vmatpush3.bf16.msra.mxu1 %v4786_v52  ;;  %3740 = vmatprep.mubr.msk.f32.mxu1 %vm4281_vm4, %v4282_v54 }
 0xde7   : > { %3935 = vmatprep.subr.bf16.mxu1 %v4280_v51 }
 0xdea   : > { %3937 = vmatpush3.bf16.msra.mxu1 %v4797_v0 }
 0xdeb   : > { %3944 = vmatprep.subr.bf16.mxu1 %v4280_v51 }
 0xeb8   : > { %v2303_v6 = vpop.f32.mrb[12].mxu1 }
 0xeb9   : > { %v2304_v2 = vadd.f32 %v2303_v6, %v2233_v5  ;;  %v3720_v3 = vpop.f32.mrb[13].mxu1 }
 0xebb   : > { %4099 = vtanh.f32 %v2304_v2  ;;  %v2723_v2 = vld [vmem:[#allocation4 + $0x98] sm:$0xff] }
 0xec5   : > { %v4100_v8 = vpop.eup %4099 }
 0xec6   : > { %v2309_v9 = vsub.f32 %v4100_v8, %v2308_v7  ;;  %v2387_v18 = vsub.f32 %v4098_v1, %v4100_v8 }
 0xec8   : > { %v2310_v10 = vmul.f32 %v2309_v9, %v2229_v58 }
 0xeca   : > { %v2311_v11 = vadd.f32 %v2310_v10, %v4929_v56 }
 0xecc   : > { %3730 = vmatmul.mubr.msk.f32.vlgmr.msra.gmra.mrb[14].mxu0 %vm1026_vm0, %v2311_v11 }
 0xecd   : > { %3940 = vmatpush3.bf16.msra.mxu0 %v4786_v52  ;;  %3751 = vmatprep.mubr.msk.f32.mxu0 %vm4281_vm4, %v4282_v54 }
 0xece   : > { %3941 = vmatprep.subr.bf16.mxu0 %v4280_v51 }
 0xed1   : > { %3943 = vmatpush3.bf16.msra.mxu0 %v4797_v0 }
 0xed2   : > { %3950 = vmatprep.subr.bf16.mxu0 %v4280_v51 }
 0xf9f   : > { %v2382_v15 = vpop.f32.mrb[14].mxu0 }
 0xfa0   : > { %v2383_v16 = vadd.f32 %v2382_v15, %v2312_v14  ;;  %v3731_v17 = vpop.f32.mrb[15].mxu0  ;;  %v2803_v14 = vstv %s2798_s29 }
 0xfa2   : > { %4101 = vtanh.f32 %v2383_v16 }
 0xfac   : > { %v4102_v19 = vpop.eup %4101 }
 0xfad   : > { %v2388_v20 = vadd.f32 %v4102_v19, %v2387_v18  ;;  %v2467_v27 = vadd.f32 %v4102_v19, %v4100_v8  ;;  %v2818_v18 = vld [vmem:[#allocation4 + $0xa0] sm:$0xff] }
 0xfaf   : > { %v2389_v21 = vmul.f32 %v2388_v20, %v2229_v58  ;;  %v2468_v28 = vmul.f32 3.0, %v2467_v27  ;;  %v2897_v27 = vld [vmem:[#allocation4 + $0xa8] sm:$0xff] }
 0xfb1   : > { %v2390_v22 = vadd.f32 %v2389_v21, %v4929_v56  ;;  %v2469_v29 = vadd.f32 %v4098_v1, %v2468_v28 }
 0xfb3   : > { %3741 = vmatmul.mubr.msk.f32.vlgmr.msra.gmra.mrb[14].mxu1 %vm1026_vm0, %v2390_v22  ;;  %v2893_v22 = vstv %s5021_s10 }
 0xfb4   : > { %3946 = vmatpush3.bf16.msra.mxu1 %v4786_v52  ;;  %3762 = vmatprep.mubr.msk.f32.mxu1 %vm4281_vm4, %v4282_v54 }
 0xfb5   : > { %3947 = vmatprep.subr.bf16.mxu1 %v4280_v51 }
 0xfb8   : > { %3949 = vmatpush3.bf16.msra.mxu1 %v4797_v0 }
 0xfb9   : > { %3956 = vmatprep.subr.bf16.mxu1 %v4280_v51 }
0x1086   : > { %v2461_v24 = vpop.f32.mrb[14].mxu1 }
0x1087   : > { %v2462_v25 = vadd.f32 %v2461_v24, %v2391_v23  ;;  %v3742_v26 = vpop.f32.mrb[15].mxu1 }
0x1089   : > { %4103 = vtanh.f32 %v2462_v25 }
0x1093   : > { %v4104_v30 = vpop.eup %4103 }
0x1094   : > { %v2470_v33 = vadd.f32 %v4104_v30, %v2469_v29 }
0x1096   : > { %v2472_v34 = vmul.f32 %v2471_v31, %v2470_v33 }
0x1098   : > { %v4970_v35 = vadd.f32 %v2472_v34, %v4929_v56 }
0x109a   : > { %3752 = vmatmul.mubr.msk.f32.vlgmr.msra.gmra.mrb[16].mxu0 %vm1026_vm0, %v4970_v35 }
0x109b   : > { %3952 = vmatpush3.bf16.msra.mxu0 %v4786_v52  ;;  %3773 = vmatprep.mubr.msk.f32.mxu0 %vm4281_vm4, %v4282_v54 }
0x109c   : > { %3953 = vmatprep.subr.bf16.mxu0 %v4280_v51 }
0x109f   : > { %3955 = vmatpush3.bf16.msra.mxu0 %v4797_v0 }
0x10a0   : > { %3962 = vmatprep.subr.bf16.mxu0 %v4280_v51 }
0x116d   : > { %v2556_v37 = vpop.f32.mrb[16].mxu0 }
0x116e   : > { %v2557_v38 = vadd.f32 %v2556_v37, %v2486_v36  ;;  %v3753_v39 = vpop.f32.mrb[17].mxu0 }
0x1170   : > { %4105 = vtanh.f32 %v2557_v38 }
0x117a   : > { %v4106_v41 = vpop.eup %4105 }
0x117b   : > { %v2562_v42 = vmul.f32 %v4106_v41, %v2561_v40  ;;  %v2640_v49 = vmul.f32 0.33333334, %v4106_v41 }
0x117d   : > { %v2563_v43 = vmul.f32 0.33333334, %v2562_v42 }
0x117f   : > { %v2564_v44 = vadd.f32 %v2563_v43, %v4970_v35 }
0x1181   : > { %3763 = vmatmul.mubr.msk.f32.vlgmr.msra.gmra.mrb[16].mxu1 %vm1026_vm0, %v2564_v44  ;;  %v3055_v44 = vld [vmem:[#allocation4 + $0xb8] sm:$0xff] }
0x1182   : > { %3958 = vmatpush3.bf16.msra.mxu1 %v4786_v52  ;;  %3784 = vmatprep.mubr.msk.f32.mxu1 %vm4281_vm4, %v4282_v54 }
0x1183   : > { %3959 = vmatprep.subr.bf16.mxu1 %v4280_v51 }
0x1186   : > { %3961 = vmatpush3.bf16.msra.mxu1 %v4797_v0 }
0x1187   : > { %3968 = vmatprep.subr.bf16.mxu1 %v4280_v51 }
0x1254   : > { %v2635_v46 = vpop.f32.mrb[16].mxu1 }
0x1255   : > { %v2636_v47 = vadd.f32 %v2635_v46, %v2565_v45  ;;  %v3764_v48 = vpop.f32.mrb[17].mxu1 }
0x1256   : > { %v1483_v48 = vpop.permute.xlu0 %1482 }
0x1257   : > { %4107 = vtanh.f32 %v2636_v47 }
0x1261   : > { %v4108_v50 = vpop.eup %4107 }
0x1262   : > { %v2641_v53 = vsub.f32 %v4108_v50, %v2640_v49  ;;  %v2719_v62 = vsub.f32 %v4106_v41, %v4108_v50 }
0x1264   : > { %v2642_v55 = vmul.f32 %v2641_v53, %v2561_v40  ;;  %v2147_v53 = vpop.permute.xlu1 %2146 }
0x1266   : > { %v2643_v59 = vadd.f32 %v2642_v55, %v4970_v35  ;;  %v1485_v55 = vmul.f32 %v1483_v48, %v4847_v32 }
0x1268   : > { %3774 = vmatmul.mubr.msk.f32.vlgmr.msra.gmra.mrb[18].mxu0 %vm1026_vm0, %v2643_v59 }
0x1269   : > { %3964 = vmatpush3.bf16.msra.mxu0 %v4786_v52  ;;  %3795 = vmatprep.mubr.msk.f32.mxu0 %vm4281_vm4, %v4282_v54 }
0x126a   : > { %3965 = vmatprep.subr.bf16.mxu0 %v4280_v51 }
0x126d   : > { %3967 = vmatpush3.bf16.msra.mxu0 %v4797_v0 }
0x126e   : > { %3974 = vmatprep.subr.bf16.mxu0 %v4280_v51 }
0x133b   : > { %v2714_v57 = vpop.f32.mrb[18].mxu0 }
0x133c   : > { %v2715_v58 = vadd.f32 %v2714_v57, %v2644_v61  ;;  %v3775_v1 = vpop.f32.mrb[19].mxu0  ;;  %v2479_v57 = vpop.permute.xlu1 %2478 }
0x133d   : > { %v2149_v1 = vmul.f32 %v2147_v53, %v4929_v56 }
0x133e   : > { %4109 = vtanh.f32 %v2715_v58  ;;  %v1486_v58 = vadd.f32 %v1485_v55, %v1156_v60 }
0x1348   : > { %v4110_v63 = vpop.eup %4109 }
0x1349   : > { %v2720_v4 = vadd.f32 %v4110_v63, %v2719_v62  ;;  %v2799_v9 = vadd.f32 %v4110_v63, %v4108_v50  ;;  %v1815_v50 = vpop.permute.xlu0 %1814 }
0x134a   : > { %v1817_v61 = vmul.f32 %v1815_v50, %v4888_v12 }
0x134b   : > { %v2721_v5 = vmul.f32 %v2720_v4, %v2561_v40  ;;  %v2800_v10 = vmul.f32 3.0, %v2799_v9 }
0x134d   : > { %v2722_v6 = vadd.f32 %v2721_v5, %v4970_v35  ;;  %v2801_v11 = vadd.f32 %v4106_v41, %v2800_v10  ;;  %v2811_v4 = vpop.permute.xlu0 %2810  ;;  %v3135_v5 = vstv %s3130_s11 }
0x134f   : > { %3785 = vmatmul.mubr.msk.f32.vlgmr.msra.gmra.mrb[18].mxu1 %vm1026_vm0, %v2722_v6  ;;  %v1818_v6 = vadd.f32 %v1817_v61, %v1486_v58 }
0x1350   : > { %3970 = vmatpush3.bf16.msra.mxu1 %v4786_v52  ;;  %3806 = vmatprep.mubr.msk.f32.mxu1 %vm4281_vm4, %v4282_v54 }
0x1351   : > { %3971 = vmatprep.subr.bf16.mxu1 %v4280_v51 }
0x1354   : > { %3973 = vmatpush3.bf16.msra.mxu1 %v4797_v0 }
0x1355   : > { %3980 = vmatprep.subr.bf16.mxu1 %v4280_v51 }
0x1422   : > { %v2793_v3 = vpop.f32.mrb[18].mxu1 }
0x1423   : > { %v2794_v7 = vadd.f32 %v2793_v3, %v2723_v2  ;;  %v3786_v8 = vpop.f32.mrb[19].mxu1  ;;  %v2481_v2 = vmul.f32 %v2479_v57, %v4970_v35 }
0x1425   : > { %4111 = vtanh.f32 %v2794_v7  ;;  %v2150_v7 = vadd.f32 %v2149_v1, %v1818_v6 }
0x1427   : > { %v2482_v9 = vadd.f32 %v2481_v2, %v2150_v7 }
0x142f   : > { %v4112_v13 = vpop.eup %4111 }
0x1430   : > { %v2802_v15 = vadd.f32 %v4112_v13, %v2801_v11 }
0x1432   : > { %v2804_v16 = vmul.f32 %v2803_v14, %v2802_v15  ;;  %v3154_v14 = vld [vmem:[%s5131_s19 + $0x8] sm:$0xff] (!%p3419_p6)  ;;  %v3155_v15 = vld [vmem:[%s5131_s19 + $0x10] sm:$0xff] (!%p3419_p6) }
0x1434   : > { %v5011_v17 = vadd.f32 %v2804_v16, %v4970_v35  ;;  %v3153_v35 = vld [vmem:[%s5131_s19] sm:$0xff] (!%p3419_p6)  ;;  %v4283_v16 = vmov (!%p3419_p6), 0.0|0.0  }
0x1436   : > { %3796 = vmatmul.mubr.msk.f32.vlgmr.msra.gmra.mrb[20].mxu0 %vm1026_vm0, %v5011_v17  ;;  %v2813_v32 = vmul.f32 %v2811_v4, %v5011_v17 }
0x1437   : > { %3976 = vmatpush3.bf16.msra.mxu0 %v4786_v52  ;;  %3817 = vmatprep.mubr.msk.f32.mxu0 %vm4281_vm4, %v4282_v54 }
0x1438   : > { %3977 = vmatprep.subr.bf16.mxu0 %v4280_v51  ;;  %v2814_v11 = vadd.f32 %v2813_v32, %v2482_v9 }
0x143b   : > { %3979 = vmatpush3.bf16.msra.mxu0 %v4797_v0 }
0x143c   : > { %3986 = vmatprep.subr.bf16.mxu0 (!%p3419_p6), %v4283_v16 }
0x1509   : > { %v2888_v19 = vpop.f32.mrb[20].mxu0 }
0x150a   : > { %v2889_v20 = vadd.f32 %v2888_v19, %v2818_v18  ;;  %v3797_v21 = vpop.f32.mrb[21].mxu0  ;;  %v3156_v18 = vld [vmem:[%s5131_s19 + $0x18] sm:$0xff] (!%p3419_p6)  ;;  %v4285_v19 = vmov (!%p3419_p6), 0.0  }
0x150b   : > { %v3420_v21 = vld [vmem:[%s5132_s16] ss:$0 sm:$0xff] (!%p3419_p6) }
0x150c   : > { %4113 = vtanh.f32 %v2889_v20  ;;  %v3990_v20 = vpack.c.bf16 (!%p3419_p6), %v3156_v18, %v3155_v15 }
0x1516   : > { %v4114_v23 = vpop.eup %4113 }
0x1517   : > { %v2894_v24 = vmul.f32 %v4114_v23, %v2893_v22  ;;  %v2972_v31 = vmul.f32 0.33333334, %v4114_v23 }
0x1519   : > { %v2895_v25 = vmul.f32 0.33333334, %v2894_v24 }
0x151b   : > { %v2896_v26 = vadd.f32 %v2895_v25, %v5011_v17 }
0x151d   : > { %3807 = vmatmul.mubr.msk.f32.vlgmr.msra.gmra.mrb[20].mxu1 %vm1026_vm0, %v2896_v26 }
0x151e   : > { %3982 = vmatpush3.bf16.msra.mxu1 %v4786_v52  ;;  %3828 = vmatprep.mubr.msk.f32.mxu1 %vm4281_vm4, %v4282_v54  ;;  %v3418_v52 = vld [vmem:[%s4605_s12 + $0x28] sm:$0xff]  ;;  %v2976_v54 = vld [vmem:[#allocation4 + $0xb0] sm:$0xff] }
0x151f   : > { %3983 = vmatprep.subr.bf16.mxu1 %v4280_v51  ;;  %3142 = vperm.xlu1 %4072, %v3418_v52  }
0x1522   : > { %3985 = vmatpush3.bf16.msra.mxu1 %v4797_v0 }
0x159e   : > { %v3143_v12 = vpop.permute.xlu1 %3142 }
0x15f0   : > { %v2967_v28 = vpop.f32.mrb[20].mxu1 }
0x15f1   : > { %v2968_v29 = vadd.f32 %v2967_v28, %v2897_v27  ;;  %v3808_v30 = vpop.f32.mrb[21].mxu1 }
0x15f3   : > { %4115 = vtanh.f32 %v2968_v29 }
0x15fd   : > { %v4116_v33 = vpop.eup %4115 }
0x15fe   : > { %v2973_v34 = vsub.f32 %v4116_v33, %v2972_v31  ;;  %v3051_v0 = vsub.f32 %v4114_v23, %v4116_v33 }
0x1600   : > { %v2974_v36 = vmul.f32 %v2973_v34, %v2893_v22 }
0x1602   : > { %v2975_v37 = vadd.f32 %v2974_v36, %v5011_v17 }
0x1604   : > { %3818 = vmatmul.mubr.msk.f32.vlgmr.msra.gmra.mrb[22].mxu0 %vm1026_vm0, %v2975_v37 }
0x1605   : > { %3839 = vmatprep.mubr.msk.f32.mxu0 (!%p3419_p6), %vm4284_vm5, %v4285_v19 }
0x16d7   : > { %v3046_v38 = vpop.f32.mrb[22].mxu0 }
0x16d8   : > { %v3047_v51 = vadd.f32 %v3046_v38, %v2976_v54  ;;  %v3819_v39 = vpop.f32.mrb[23].mxu0 }
0x16da   : > { %4117 = vtanh.f32 %v3047_v51 }
0x16e4   : > { %v4118_v40 = vpop.eup %4117 }
0x16e5   : > { %v3052_v41 = vadd.f32 %v4118_v40, %v3051_v0  ;;  %v3131_v49 = vadd.f32 %v4118_v40, %v4116_v33 }
0x16e7   : > { %v3053_v42 = vmul.f32 %v3052_v41, %v2893_v22  ;;  %v3132_v59 = vmul.f32 3.0, %v3131_v49 }
0x16e9   : > { %v3054_v43 = vadd.f32 %v3053_v42, %v5011_v17  ;;  %v3133_v62 = vadd.f32 %v4114_v23, %v3132_v59 }
0x16eb   : > { %3829 = vmatmul.mubr.msk.f32.vlgmr.msra.gmra.mrb[22].mxu1 %vm1026_vm0, %v3054_v43 }
0x17be   : > { %v3125_v45 = vpop.f32.mrb[22].mxu1 }
0x17bf   : > { %v3126_v46 = vadd.f32 %v3125_v45, %v3055_v44  ;;  %v3830_v47 = vpop.f32.mrb[23].mxu1 }
0x17c1   : > { %4119 = vtanh.f32 %v3126_v46 }
0x17cb   : > { %v4120_v63 = vpop.eup %4119 }
0x17cc   : > { %v3134_v3 = vadd.f32 %v4120_v63, %v3133_v62 }
0x17ce   : > { %v3136_v8 = vmul.f32 %v3135_v5, %v3134_v3 }
0x17d0   : > { %v3137_v10 = vadd.f32 %v3136_v8, %v5011_v17  ;;  %3152 = sbr.rel (%p3419_p6) target bundleno = 6320 (0x18b0), region = 100  ;;  %v3987_v17 = vpack.c.bf16 (!%p3419_p6), %v3154_v14, %v3153_v35 }
0x17d2   : > { %v3145_v13 = vmul.f32 %v3143_v12, %v3137_v10  ;;  %3147 = vst.msk [vmem:[#allocation2] sm:$0xff] %vm1026_vm0, %v3137_v10  ;;  %3988 = vmatpush3.bf16.msra.mxu0 (!%p3419_p6), %v3987_v17 }
0x17d3   : > { %3989 = vmatprep.subr.bf16.mxu0 (!%p3419_p6), %v4283_v16 }
0x17d4   : > { %v3146_v56 = vadd.f32 %v3145_v13, %v2814_v11 }
0x17d6   : > { %3148 = vst.msk [vmem:[#allocation3] sm:$0xff] %vm1026_vm0, %v3146_v56  ;;  %3991 = vmatpush3.bf16.msra.mxu0 (!%p3419_p6), %v3990_v20 }
0x17d9   : > { %3840 = vmatmul.mubr.msk.f32.vlgmr.msra.gmra.mrb[0].mxu0 %vm1026_vm0, %v3146_v56 }
0x18ac   : > { %v3233_v22 = vpop.f32.mrb[0].mxu0 }
0x18ad   : > { %v3234_v23 = vadd.f32 %v3420_v21, %v3233_v22  ;;  %v3841_v24 = vpop.f32.mrb[1].mxu0 }
0x18af   : > { %3238 = vst.msk [vmem:[%s5133_s2] sm:$0xff] %vm3237_vm6, %v3234_v23 }
0x18b0 PF: > { %s5134_s16 = sld [smem:[#allocation15_spill]]  ;;  %s5135_s17 = sld [smem:[#allocation16_spill]] }
0x18b1   : > { %s5136_s29 = smov %s4260_s30  ;;  %s5137_s30 = smov %s4264_s15 }
0x18b6   : > { %p28_p0 = scmp.ge.s32.totalorder %s5134_s16, 4   ;;  %s5138_s15 = smov %s5135_s17 }
0x18b8   :  { %30 = sbr.rel (!%p28_p0) target bundleno = 13 (0xd), region = 168 }
0x18bf   :  { %3250 = vsyncpa [#allocation6], 1 }
0x18c0   :  { %3252 = vsyncpa [#allocation6 + $0x1], 1 }
0x18c1   :  { %3253 = vsyncpa [#allocation9], 1 }
0x18c2   :  { %3255 = vsyncpa [#allocation9 + $0x1], 1 }
0x18c3   :  { %3256 = vsyncpa [#allocation7], 1 }
0x18c4   :  { %3258 = vsyncpa [#allocation7 + $0x1], 1 }

</bundles_post_ra>
